<compile_context>
chip_gen: v7x
topology: tpu7x:2x2x1
jax: 0.10.0
libtpu: 0.0.40
codegen_flags: <defaults>
</compile_context>

<pallas_src>
import functools

import jax
import jax.numpy as jnp
import numpy as np
from jax.experimental import pallas as pl
from jax.experimental.pallas import tpu as pltpu

EPS = 1e-5     # nn.BatchNorm1d default
LANE = 128     # TPU lane width; channel dims are zero-padded to multiples of it


def _round_up(n, m):
    return ((n + m - 1) // m) * m


# --------------------------------- kernel ------------------------------------
def scale_translate_cnn_kernel(taps1_ref,
                               w1_ref, g1_ref, b1_ref,
                               w2_ref, g2_ref, b2_ref,
                               w3_ref, g3_ref, b3_ref,
                               w4_ref,
                               out_ref, *, seq_len):
    """Whole forward on a flat (B*L, Cpad) slab (channels on lanes)."""
    bl = out_ref.shape[0]
    n_inv = 1.0 / bl                       # BatchNorm count = batch * length

    # Sequence-boundary masks from an in-kernel iota (pure VPU, no DMA'd masks).
    l_idx = jax.lax.broadcasted_iota(jnp.int32, (bl, 1), 0) % seq_len
    not_first = l_idx != 0                 # row is not l == 0 of its sequence
    not_last = l_idx != (seq_len - 1)      # row is not l == L-1 of its sequence

    def conv3(h, w_ref):
        # 3-tap "same" conv as ONE matmul: taps = [h[l-1] | h[l] | h[l+1]]
        # against w pre-reshaped to (3*Cin_pad, Cout_pad).  Shifted taps are
        # sublane rolls (XLU); rows that would cross a sequence (batch)
        # boundary are zeroed, reproducing the conv's zero padding.  Taps are
        # cast to bf16 BEFORE the concat so the 3x-wide slab only ever exists
        # in bf16 (halves peak temporary footprint / vst traffic).
        prev = jnp.where(not_first, pltpu.roll(h, shift=1, axis=0),
                         0.0).astype(jnp.bfloat16)                   # h[l-1]
        nxt = jnp.where(not_last, pltpu.roll(h, shift=bl - 1, axis=0),
                        0.0).astype(jnp.bfloat16)                    # h[l+1]
        taps = jnp.concatenate([prev, h.astype(jnp.bfloat16), nxt], axis=1)
        return jnp.dot(taps, w_ref[...], preferred_element_type=jnp.float32)

    def relu_bn(h, g_ref, b_ref):
        # ReLU + training-mode BatchNorm1d (biased batch statistics):
        # one-pass stats, variance clamped >= 0, applied as one per-channel FMA.
        h = jnp.maximum(h, 0.0)
        mean = jnp.sum(h, axis=0, keepdims=True) * n_inv              # (1, C)
        msq = jnp.sum(h * h, axis=0, keepdims=True) * n_inv           # (1, C)
        var = jnp.maximum(msq - mean * mean, 0.0)
        scale = g_ref[...] * jax.lax.rsqrt(var + EPS)
        shift = b_ref[...] - mean * scale
        return h * scale + shift

    # Layer 1: taps slab pre-built in the wrapper -> K = 128 instead of 384.
    h = jnp.dot(taps1_ref[...], w1_ref[...], preferred_element_type=jnp.float32)
    h = relu_bn(h, g1_ref, b1_ref)
    h = relu_bn(conv3(h, w2_ref), g2_ref, b2_ref)
    h = relu_bn(conv3(h, w3_ref), g3_ref, b3_ref)
    out_ref[...] = conv3(h, w4_ref)   # cols [0,C)=log_scale, [C,2C)=translate


# ------------------------------ wrapper (glue) --------------------------------
def scale_translate_cnn(x_ncl, ws_torch, gammas, betas):
    """x_ncl: (B, C, L) as in PyTorch. Returns (log_scale, translate), each (B, C, L)."""
    B, C, L = x_ncl.shape
    BL = B * L
    c_out = 2 * C

    couts = [w.shape[0] for w in ws_torch]            # 64, 128, 256, 2C
    cins = [C, couts[0], couts[1], couts[2]]
    cins_p = [_round_up(c, LANE) for c in cins]
    couts_p = [_round_up(c, LANE) for c in couts]
    k1 = _round_up(3 * C, LANE)                       # layer-1 contraction width

    # ---- layer-1 taps slab, pre-built with free XLA work ---------------------
    x_nlc = jnp.transpose(x_ncl, (0, 2, 1)).astype(jnp.float32)       # (B,L,C)
    zrow = jnp.zeros((B, 1, C), jnp.float32)
    prev = jnp.concatenate([zrow, x_nlc[:, :-1, :]], axis=1)          # x[l-1]
    nxt = jnp.concatenate([x_nlc[:, 1:, :], zrow], axis=1)            # x[l+1]
    taps1 = jnp.concatenate([prev, x_nlc, nxt], axis=2).reshape(BL, 3 * C)
    taps1 = jnp.pad(taps1, ((0, 0), (0, k1 - 3 * C))).astype(jnp.bfloat16)

    # torch conv weight (O, I, K) -> tap-major matmul weight (K*Ipad, Opad)
    # in bf16, matching the [prev | cur | next] tap order.
    def prep_w(w, cin_pad, cout_pad, out_perm=None):
        if out_perm is not None:
            w = w[out_perm]                                          # reorder O
        o, i, k = w.shape
        w_kio = jnp.transpose(w, (2, 1, 0)).astype(jnp.float32)      # (K, I, O)
        w_kio = jnp.pad(w_kio, ((0, 0), (0, cin_pad - i), (0, cout_pad - o)))
        return w_kio.reshape(k * cin_pad, cout_pad).astype(jnp.bfloat16)

    # gamma padded with 1, beta with 0 -> padded (all-zero) channels stay zero.
    def prep_gb(g, b, c_pad):
        c = g.shape[0]
        gp = jnp.pad(g.astype(jnp.float32), (0, c_pad - c), constant_values=1.0)
        bp = jnp.pad(b.astype(jnp.float32), (0, c_pad - c))
        return gp.reshape(1, c_pad), bp.reshape(1, c_pad)

    # Layer-1 weight uses the compact 3*C tap layout, then pads rows to k1.
    w1 = prep_w(ws_torch[0], C, couts_p[0])                          # (3*C, 128)
    w1 = jnp.pad(w1, ((0, k1 - 3 * C), (0, 0)))                      # (128, 128)
    w2 = prep_w(ws_torch[1], cins_p[1], couts_p[1])                  # (384, 128)
    w3 = prep_w(ws_torch[2], cins_p[2], couts_p[2])                  # (384, 256)
    # Permute w4's output columns: even channels (log_scale) first, odd second.
    perm = jnp.concatenate([jnp.arange(0, c_out, 2), jnp.arange(1, c_out, 2)])
    w4 = prep_w(ws_torch[3], cins_p[3], couts_p[3], out_perm=perm)   # (768, 128)

    g1, b1 = prep_gb(gammas[0], betas[0], couts_p[0])
    g2, b2 = prep_gb(gammas[1], betas[1], couts_p[1])
    g3, b3 = prep_gb(gammas[2], betas[2], couts_p[2])

    args = (taps1, w1, g1, b1, w2, g2, b2, w3, g3, b3, w4)

    # Advisory cost estimate for the four MXU matmuls (padded dims).
    flops = 2 * BL * (k1 * couts_p[0]
                      + 3 * cins_p[1] * couts_p[1]
                      + 3 * cins_p[2] * couts_p[2]
                      + 3 * cins_p[3] * couts_p[3])
    transcendentals = couts_p[0] + couts_p[1] + couts_p[2]   # one rsqrt / channel
    bytes_accessed = (sum(int(np.prod(a.shape)) * a.dtype.itemsize for a in args)
                      + BL * couts_p[3] * 4)

    vmem = pl.BlockSpec(memory_space=pltpu.MemorySpace.VMEM)
    out2d = pl.pallas_call(
        functools.partial(scale_translate_cnn_kernel, seq_len=L),
        out_shape=jax.ShapeDtypeStruct((BL, couts_p[3]), jnp.float32),
        in_specs=[vmem] * len(args),          # 11 specs for 11 inputs
        out_specs=vmem,
        compiler_params=pltpu.CompilerParams(
            vmem_limit_bytes=32 * 1024 * 1024),
        cost_estimate=pl.CostEstimate(
            flops=int(flops),
            transcendentals=int(transcendentals),
            bytes_accessed=int(bytes_accessed)),
    )(*args)

    # Lane-dense slab -> (B, L, 2C); contiguous split (w4 columns were permuted).
    out_nlc = out2d[:, :c_out].reshape(B, L, c_out)
    log_scale = jnp.transpose(out_nlc[:, :, :C], (0, 2, 1))          # (B, C, L)
    translate = jnp.transpose(out_nlc[:, :, C:], (0, 2, 1))
    # .reshape(B, *input_shape) with input_shape == (C, L) is the identity here.
    return log_scale, translate


# ----------------------- deterministic parameter init ------------------------
def init_params(key, c_in, filters=64):
    conv_dims = [(filters, c_in),
                 (filters * 2, filters),
                 (filters * 4, filters * 2),
                 (2 * c_in, filters * 4)]
    wkeys = jax.random.split(key, 4)
    ws_torch = []
    for k, (co, ci) in zip(wkeys, conv_dims):
        std = (2.0 / (ci * 3)) ** 0.5
        ws_torch.append(std * jax.random.normal(k, (co, ci, 3), jnp.float32))

    gkeys = jax.random.split(jax.random.fold_in(key, 7), 6)
    gammas, betas = [], []
    for i, c in enumerate([filters, filters * 2, filters * 4]):
        gammas.append(1.0 + 0.1 * jax.random.normal(gkeys[2 * i], (c,), jnp.float32))
        betas.append(0.1 * jax.random.normal(gkeys[2 * i + 1], (c,), jnp.float32))
    return ws_torch, gammas, betas


# ------------------------- pure-JAX reference (NCL) ---------------------------
def reference_forward(x_ncl, ws_torch, gammas, betas):
    """Reference with the same bf16-operand / f32-accumulate matmul precision
    as the kernel (ReLU / BatchNorm in f32), so the comparison isolates the
    algorithm rather than the deliberate bf16 approximation."""
    def conv(h, w):
        return jax.lax.conv_general_dilated(
            h.astype(jnp.bfloat16), w.astype(jnp.bfloat16),
            window_strides=(1,), padding=((1, 1),),
            dimension_numbers=('NCH', 'OIH', 'NCH'),
            preferred_element_type=jnp.float32)

    h = x_ncl.astype(jnp.float32)
    for i in range(3):
        h = jnp.maximum(conv(h, ws_torch[i]), 0.0)
        mean = jnp.mean(h, axis=(0, 2), keepdims=True)
        var = jnp.mean(jnp.square(h - mean), axis=(0, 2), keepdims=True)
        g = gammas[i].reshape(1, -1, 1)
        b = betas[i].reshape(1, -1, 1)
        h = (h - mean) * jax.lax.rsqrt(var + EPS) * g + b
    h = conv(h, ws_torch[3])
    return h[:, 0::2, :], h[:, 1::2, :]


# ----------------------------------- main -------------------------------------
if __name__ == "__main__":
    B, C, L = 2, 4, 16                   # input_shape = (C, L) = (4, 16)
    hidden = 32                          # unused by the module's CNN (filters=64 fixed)

    key = jax.random.PRNGKey(0)
    kx, kp = jax.random.split(key)
    x = jax.random.normal(kx, (B, C, L), jnp.float32)         # PyTorch NCL input
    ws_torch, gammas, betas = init_params(kp, C)

    log_scale, translate = scale_translate_cnn(x, ws_torch, gammas, betas)
    jax.block_until_ready((log_scale, translate))

    ls_ref, tr_ref = reference_forward(x, ws_torch, gammas, betas)
    np.testing.assert_allclose(np.asarray(log_scale), np.asarray(ls_ref),
                               rtol=5e-3, atol=5e-3)
    np.testing.assert_allclose(np.asarray(translate), np.asarray(tr_ref),
                               rtol=5e-3, atol=5e-3)
    print("KERNEL_OK")
</pallas_src>

<mosaic_0001>
module attributes {stable_mosaic.version = 11 : i64} {
  func.func @scale_translate_cnn_kernel(%arg0: memref<32x128xbf16, #tpu.memory_space<vmem>>, %arg1: memref<128x128xbf16, #tpu.memory_space<vmem>>, %arg2: memref<1x128xf32, #tpu.memory_space<vmem>>, %arg3: memref<1x128xf32, #tpu.memory_space<vmem>>, %arg4: memref<384x128xbf16, #tpu.memory_space<vmem>>, %arg5: memref<1x128xf32, #tpu.memory_space<vmem>>, %arg6: memref<1x128xf32, #tpu.memory_space<vmem>>, %arg7: memref<384x256xbf16, #tpu.memory_space<vmem>>, %arg8: memref<1x256xf32, #tpu.memory_space<vmem>>, %arg9: memref<1x256xf32, #tpu.memory_space<vmem>>, %arg10: memref<768x128xbf16, #tpu.memory_space<vmem>>, %arg11: memref<32x128xf32, #tpu.memory_space<vmem>>) attributes {dimension_semantics = [], scalar_prefetch = 0 : i64, scratch_operands = 0 : i64, tpu.core_type = #tpu.core_type<tc>} {
    %0 = tpu.iota {dimensions = array<i32: 0>} : vector<32x1xi32>
    %c16_i32 = arith.constant 16 : i32
    %c0_i32 = arith.constant 0 : i32
    %1 = arith.cmpi eq, %c16_i32, %c0_i32 : i32
    %c1_i32 = arith.constant 1 : i32
    %2 = arith.select %1, %c1_i32, %c16_i32 : i32
    %3 = vector.broadcast %2 : i32 to vector<32x1xi32>
    %4 = arith.remsi %0, %3 : vector<32x1xi32>
    %c0_i32_0 = arith.constant 0 : i32
    %5 = vector.broadcast %c0_i32_0 : i32 to vector<32x1xi32>
    %6 = arith.cmpi ne, %4, %5 : vector<32x1xi32>
    %c0_i32_1 = arith.constant 0 : i32
    %7 = vector.broadcast %c0_i32_1 : i32 to vector<32x1xi32>
    %8 = arith.cmpi slt, %4, %7 : vector<32x1xi32>
    %c0_i32_2 = arith.constant 0 : i32
    %9 = arith.cmpi slt, %2, %c0_i32_2 : i32
    %10 = vector.broadcast %9 : i1 to vector<32x1xi1>
    %11 = vector.broadcast %10 : vector<32x1xi1> to vector<32x1xi1>
    %12 = arith.xori %8, %11 : vector<32x1xi1>
    %13 = arith.andi %12, %6 : vector<32x1xi1>
    %14 = vector.broadcast %2 : i32 to vector<32x1xi32>
    %15 = arith.addi %4, %14 : vector<32x1xi32>
    %16 = arith.select %13, %15, %4 : vector<32x1xi1>, vector<32x1xi32>
    %c0_i32_3 = arith.constant 0 : i32
    %17 = vector.broadcast %c0_i32_3 : i32 to vector<32x1xi32>
    %18 = arith.cmpi ne, %16, %17 : vector<32x1xi32>
    %c15_i32 = arith.constant 15 : i32
    %19 = vector.broadcast %c15_i32 : i32 to vector<32x1xi32>
    %20 = arith.cmpi ne, %16, %19 : vector<32x1xi32>
    %c0 = arith.constant 0 : index
    %c0_4 = arith.constant 0 : index
    %21 = vector.load %arg0[%c0, %c0_4] : memref<32x128xbf16, #tpu.memory_space<vmem>>, vector<32x128xbf16>
    %c0_5 = arith.constant 0 : index
    %c0_6 = arith.constant 0 : index
    %22 = vector.load %arg1[%c0_5, %c0_6] : memref<128x128xbf16, #tpu.memory_space<vmem>>, vector<128x128xbf16>
    %cst = arith.constant dense<0.000000e+00> : vector<32x128xf32>
    %23 = tpu.matmul %21, %22, %cst {dimension_numbers = #tpu.dot_dimension_numbers<[1], [0], [0], [1], [0, 0, 1, 1], [], []>} : vector<32x128xbf16>, vector<128x128xbf16>, vector<32x128xf32> -> vector<32x128xf32>
    %cst_7 = arith.constant 0.000000e+00 : f32
    %24 = vector.broadcast %cst_7 : f32 to vector<32x128xf32>
    %25 = arith.maximumf %23, %24 : vector<32x128xf32>
    %cst_8 = arith.constant dense<0.000000e+00> : vector<128xf32>
    %26 = vector.multi_reduction <add>, %25, %cst_8 [0] : vector<32x128xf32> to vector<128xf32>
    %27 = vector.shape_cast %26 : vector<128xf32> to vector<1x128xf32>
    %cst_9 = arith.constant 3.125000e-02 : f32
    %28 = vector.broadcast %cst_9 : f32 to vector<1x128xf32>
    %29 = arith.mulf %27, %28 : vector<1x128xf32>
    %30 = arith.mulf %25, %25 : vector<32x128xf32>
    %cst_10 = arith.constant dense<0.000000e+00> : vector<128xf32>
    %31 = vector.multi_reduction <add>, %30, %cst_10 [0] : vector<32x128xf32> to vector<128xf32>
    %32 = vector.shape_cast %31 : vector<128xf32> to vector<1x128xf32>
    %cst_11 = arith.constant 3.125000e-02 : f32
    %33 = vector.broadcast %cst_11 : f32 to vector<1x128xf32>
    %34 = arith.mulf %32, %33 : vector<1x128xf32>
    %35 = arith.mulf %29, %29 : vector<1x128xf32>
    %36 = arith.subf %34, %35 : vector<1x128xf32>
    %cst_12 = arith.constant 0.000000e+00 : f32
    %37 = vector.broadcast %cst_12 : f32 to vector<1x128xf32>
    %38 = arith.maximumf %36, %37 : vector<1x128xf32>
    %c0_13 = arith.constant 0 : index
    %c0_14 = arith.constant 0 : index
    %39 = vector.load %arg2[%c0_13, %c0_14] : memref<1x128xf32, #tpu.memory_space<vmem>>, vector<1x128xf32>
    %cst_15 = arith.constant 9.99999974E-6 : f32
    %40 = vector.broadcast %cst_15 : f32 to vector<1x128xf32>
    %41 = arith.addf %38, %40 : vector<1x128xf32>
    %42 = math.rsqrt %41 : vector<1x128xf32>
    %43 = arith.mulf %39, %42 : vector<1x128xf32>
    %c0_16 = arith.constant 0 : index
    %c0_17 = arith.constant 0 : index
    %44 = vector.load %arg3[%c0_16, %c0_17] : memref<1x128xf32, #tpu.memory_space<vmem>>, vector<1x128xf32>
    %45 = arith.mulf %29, %43 : vector<1x128xf32>
    %46 = arith.subf %44, %45 : vector<1x128xf32>
    %47 = vector.broadcast %43 : vector<1x128xf32> to vector<32x128xf32>
    %48 = arith.mulf %25, %47 : vector<32x128xf32>
    %49 = vector.broadcast %46 : vector<1x128xf32> to vector<32x128xf32>
    %50 = arith.addf %48, %49 : vector<32x128xf32>
    %c1_i32_18 = arith.constant 1 : i32
    %51 = tpu.dynamic_rotate %50 by %c1_i32_18 dim 0 : vector<32x128xf32>, i32 -> vector<32x128xf32>
    %cst_19 = arith.constant 0.000000e+00 : f32
    %52 = vector.shape_cast %18 : vector<32x1xi1> to vector<32x1xi1>
    %53 = vector.broadcast %52 : vector<32x1xi1> to vector<32x128xi1>
    %54 = vector.broadcast %cst_19 : f32 to vector<32x128xf32>
    %55 = arith.select %53, %51, %54 : vector<32x128xi1>, vector<32x128xf32>
    %56 = arith.truncf %55 : vector<32x128xf32> to vector<32x128xbf16>
    %c31_i32 = arith.constant 31 : i32
    %57 = tpu.dynamic_rotate %50 by %c31_i32 dim 0 : vector<32x128xf32>, i32 -> vector<32x128xf32>
    %cst_20 = arith.constant 0.000000e+00 : f32
    %58 = vector.shape_cast %20 : vector<32x1xi1> to vector<32x1xi1>
    %59 = vector.broadcast %58 : vector<32x1xi1> to vector<32x128xi1>
    %60 = vector.broadcast %cst_20 : f32 to vector<32x128xf32>
    %61 = arith.select %59, %57, %60 : vector<32x128xi1>, vector<32x128xf32>
    %62 = arith.truncf %61 : vector<32x128xf32> to vector<32x128xbf16>
    %63 = arith.truncf %50 : vector<32x128xf32> to vector<32x128xbf16>
    %64 = tpu.concatenate %56, %63, %62 in 1 : vector<32x128xbf16>, vector<32x128xbf16>, vector<32x128xbf16> -> vector<32x384xbf16>
    %c0_21 = arith.constant 0 : index
    %c0_22 = arith.constant 0 : index
    %65 = vector.load %arg4[%c0_21, %c0_22] : memref<384x128xbf16, #tpu.memory_space<vmem>>, vector<384x128xbf16>
    %cst_23 = arith.constant dense<0.000000e+00> : vector<32x128xf32>
    %66 = tpu.matmul %64, %65, %cst_23 {dimension_numbers = #tpu.dot_dimension_numbers<[1], [0], [0], [1], [0, 0, 1, 1], [], []>} : vector<32x384xbf16>, vector<384x128xbf16>, vector<32x128xf32> -> vector<32x128xf32>
    %cst_24 = arith.constant 0.000000e+00 : f32
    %67 = vector.broadcast %cst_24 : f32 to vector<32x128xf32>
    %68 = arith.maximumf %66, %67 : vector<32x128xf32>
    %cst_25 = arith.constant dense<0.000000e+00> : vector<128xf32>
    %69 = vector.multi_reduction <add>, %68, %cst_25 [0] : vector<32x128xf32> to vector<128xf32>
    %70 = vector.shape_cast %69 : vector<128xf32> to vector<1x128xf32>
    %cst_26 = arith.constant 3.125000e-02 : f32
    %71 = vector.broadcast %cst_26 : f32 to vector<1x128xf32>
    %72 = arith.mulf %70, %71 : vector<1x128xf32>
    %73 = arith.mulf %68, %68 : vector<32x128xf32>
    %cst_27 = arith.constant dense<0.000000e+00> : vector<128xf32>
    %74 = vector.multi_reduction <add>, %73, %cst_27 [0] : vector<32x128xf32> to vector<128xf32>
    %75 = vector.shape_cast %74 : vector<128xf32> to vector<1x128xf32>
    %cst_28 = arith.constant 3.125000e-02 : f32
    %76 = vector.broadcast %cst_28 : f32 to vector<1x128xf32>
    %77 = arith.mulf %75, %76 : vector<1x128xf32>
    %78 = arith.mulf %72, %72 : vector<1x128xf32>
    %79 = arith.subf %77, %78 : vector<1x128xf32>
    %cst_29 = arith.constant 0.000000e+00 : f32
    %80 = vector.broadcast %cst_29 : f32 to vector<1x128xf32>
    %81 = arith.maximumf %79, %80 : vector<1x128xf32>
    %c0_30 = arith.constant 0 : index
    %c0_31 = arith.constant 0 : index
    %82 = vector.load %arg5[%c0_30, %c0_31] : memref<1x128xf32, #tpu.memory_space<vmem>>, vector<1x128xf32>
    %cst_32 = arith.constant 9.99999974E-6 : f32
    %83 = vector.broadcast %cst_32 : f32 to vector<1x128xf32>
    %84 = arith.addf %81, %83 : vector<1x128xf32>
    %85 = math.rsqrt %84 : vector<1x128xf32>
    %86 = arith.mulf %82, %85 : vector<1x128xf32>
    %c0_33 = arith.constant 0 : index
    %c0_34 = arith.constant 0 : index
    %87 = vector.load %arg6[%c0_33, %c0_34] : memref<1x128xf32, #tpu.memory_space<vmem>>, vector<1x128xf32>
    %88 = arith.mulf %72, %86 : vector<1x128xf32>
    %89 = arith.subf %87, %88 : vector<1x128xf32>
    %90 = vector.broadcast %86 : vector<1x128xf32> to vector<32x128xf32>
    %91 = arith.mulf %68, %90 : vector<32x128xf32>
    %92 = vector.broadcast %89 : vector<1x128xf32> to vector<32x128xf32>
    %93 = arith.addf %91, %92 : vector<32x128xf32>
    %c1_i32_35 = arith.constant 1 : i32
    %94 = tpu.dynamic_rotate %93 by %c1_i32_35 dim 0 : vector<32x128xf32>, i32 -> vector<32x128xf32>
    %cst_36 = arith.constant 0.000000e+00 : f32
    %95 = vector.shape_cast %18 : vector<32x1xi1> to vector<32x1xi1>
    %96 = vector.broadcast %95 : vector<32x1xi1> to vector<32x128xi1>
    %97 = vector.broadcast %cst_36 : f32 to vector<32x128xf32>
    %98 = arith.select %96, %94, %97 : vector<32x128xi1>, vector<32x128xf32>
    %99 = arith.truncf %98 : vector<32x128xf32> to vector<32x128xbf16>
    %c31_i32_37 = arith.constant 31 : i32
    %100 = tpu.dynamic_rotate %93 by %c31_i32_37 dim 0 : vector<32x128xf32>, i32 -> vector<32x128xf32>
    %cst_38 = arith.constant 0.000000e+00 : f32
    %101 = vector.shape_cast %20 : vector<32x1xi1> to vector<32x1xi1>
    %102 = vector.broadcast %101 : vector<32x1xi1> to vector<32x128xi1>
    %103 = vector.broadcast %cst_38 : f32 to vector<32x128xf32>
    %104 = arith.select %102, %100, %103 : vector<32x128xi1>, vector<32x128xf32>
    %105 = arith.truncf %104 : vector<32x128xf32> to vector<32x128xbf16>
    %106 = arith.truncf %93 : vector<32x128xf32> to vector<32x128xbf16>
    %107 = tpu.concatenate %99, %106, %105 in 1 : vector<32x128xbf16>, vector<32x128xbf16>, vector<32x128xbf16> -> vector<32x384xbf16>
    %c0_39 = arith.constant 0 : index
    %c0_40 = arith.constant 0 : index
    %108 = vector.load %arg7[%c0_39, %c0_40] : memref<384x256xbf16, #tpu.memory_space<vmem>>, vector<384x256xbf16>
    %cst_41 = arith.constant dense<0.000000e+00> : vector<32x256xf32>
    %109 = tpu.matmul %107, %108, %cst_41 {dimension_numbers = #tpu.dot_dimension_numbers<[1], [0], [0], [1], [0, 0, 1, 1], [], []>} : vector<32x384xbf16>, vector<384x256xbf16>, vector<32x256xf32> -> vector<32x256xf32>
    %cst_42 = arith.constant 0.000000e+00 : f32
    %110 = vector.broadcast %cst_42 : f32 to vector<32x256xf32>
    %111 = arith.maximumf %109, %110 : vector<32x256xf32>
    %cst_43 = arith.constant dense<0.000000e+00> : vector<256xf32>
    %112 = vector.multi_reduction <add>, %111, %cst_43 [0] : vector<32x256xf32> to vector<256xf32>
    %113 = vector.shape_cast %112 : vector<256xf32> to vector<1x256xf32>
    %cst_44 = arith.constant 3.125000e-02 : f32
    %114 = vector.broadcast %cst_44 : f32 to vector<1x256xf32>
    %115 = arith.mulf %113, %114 : vector<1x256xf32>
    %116 = arith.mulf %111, %111 : vector<32x256xf32>
    %cst_45 = arith.constant dense<0.000000e+00> : vector<256xf32>
    %117 = vector.multi_reduction <add>, %116, %cst_45 [0] : vector<32x256xf32> to vector<256xf32>
    %118 = vector.shape_cast %117 : vector<256xf32> to vector<1x256xf32>
    %cst_46 = arith.constant 3.125000e-02 : f32
    %119 = vector.broadcast %cst_46 : f32 to vector<1x256xf32>
    %120 = arith.mulf %118, %119 : vector<1x256xf32>
    %121 = arith.mulf %115, %115 : vector<1x256xf32>
    %122 = arith.subf %120, %121 : vector<1x256xf32>
    %cst_47 = arith.constant 0.000000e+00 : f32
    %123 = vector.broadcast %cst_47 : f32 to vector<1x256xf32>
    %124 = arith.maximumf %122, %123 : vector<1x256xf32>
    %c0_48 = arith.constant 0 : index
    %c0_49 = arith.constant 0 : index
    %125 = vector.load %arg8[%c0_48, %c0_49] : memref<1x256xf32, #tpu.memory_space<vmem>>, vector<1x256xf32>
    %cst_50 = arith.constant 9.99999974E-6 : f32
    %126 = vector.broadcast %cst_50 : f32 to vector<1x256xf32>
    %127 = arith.addf %124, %126 : vector<1x256xf32>
    %128 = math.rsqrt %127 : vector<1x256xf32>
    %129 = arith.mulf %125, %128 : vector<1x256xf32>
    %c0_51 = arith.constant 0 : index
    %c0_52 = arith.constant 0 : index
    %130 = vector.load %arg9[%c0_51, %c0_52] : memref<1x256xf32, #tpu.memory_space<vmem>>, vector<1x256xf32>
    %131 = arith.mulf %115, %129 : vector<1x256xf32>
    %132 = arith.subf %130, %131 : vector<1x256xf32>
    %133 = vector.broadcast %129 : vector<1x256xf32> to vector<32x256xf32>
    %134 = arith.mulf %111, %133 : vector<32x256xf32>
    %135 = vector.broadcast %132 : vector<1x256xf32> to vector<32x256xf32>
    %136 = arith.addf %134, %135 : vector<32x256xf32>
    %c1_i32_53 = arith.constant 1 : i32
    %137 = tpu.dynamic_rotate %136 by %c1_i32_53 dim 0 : vector<32x256xf32>, i32 -> vector<32x256xf32>
    %cst_54 = arith.constant 0.000000e+00 : f32
    %138 = vector.shape_cast %18 : vector<32x1xi1> to vector<32x1xi1>
    %139 = vector.broadcast %138 : vector<32x1xi1> to vector<32x256xi1>
    %140 = vector.broadcast %cst_54 : f32 to vector<32x256xf32>
    %141 = arith.select %139, %137, %140 : vector<32x256xi1>, vector<32x256xf32>
    %142 = arith.truncf %141 : vector<32x256xf32> to vector<32x256xbf16>
    %c31_i32_55 = arith.constant 31 : i32
    %143 = tpu.dynamic_rotate %136 by %c31_i32_55 dim 0 : vector<32x256xf32>, i32 -> vector<32x256xf32>
    %cst_56 = arith.constant 0.000000e+00 : f32
    %144 = vector.shape_cast %20 : vector<32x1xi1> to vector<32x1xi1>
    %145 = vector.broadcast %144 : vector<32x1xi1> to vector<32x256xi1>
    %146 = vector.broadcast %cst_56 : f32 to vector<32x256xf32>
    %147 = arith.select %145, %143, %146 : vector<32x256xi1>, vector<32x256xf32>
    %148 = arith.truncf %147 : vector<32x256xf32> to vector<32x256xbf16>
    %149 = arith.truncf %136 : vector<32x256xf32> to vector<32x256xbf16>
    %150 = tpu.concatenate %142, %149, %148 in 1 : vector<32x256xbf16>, vector<32x256xbf16>, vector<32x256xbf16> -> vector<32x768xbf16>
    %c0_57 = arith.constant 0 : index
    %c0_58 = arith.constant 0 : index
    %151 = vector.load %arg10[%c0_57, %c0_58] : memref<768x128xbf16, #tpu.memory_space<vmem>>, vector<768x128xbf16>
    %cst_59 = arith.constant dense<0.000000e+00> : vector<32x128xf32>
    %152 = tpu.matmul %150, %151, %cst_59 {dimension_numbers = #tpu.dot_dimension_numbers<[1], [0], [0], [1], [0, 0, 1, 1], [], []>} : vector<32x768xbf16>, vector<768x128xbf16>, vector<32x128xf32> -> vector<32x128xf32>
    %c0_60 = arith.constant 0 : index
    %c0_61 = arith.constant 0 : index
    %153 = vector.load %arg11[%c0_60, %c0_61] : memref<32x128xf32, #tpu.memory_space<vmem>>, vector<32x128xf32>
    tpu.vector_store %arg11[%c0_60, %c0_61], %152 {strides = array<i32>} : memref<32x128xf32, #tpu.memory_space<vmem>>, vector<32x128xf32>,
    return
  }
}

</mosaic_0001>

<bundles_post_ra>
// kernel: tpu_custom_call.1
= control target key start
LH: loop header
LB: loop body
LE: loop exit
PB: predicated region body
PF: predicated region fallthrough
CT: control target
= control target key end

     0   :  { %16 = vsyncpa [#allocation3], 0  ;;  %s3119_s0 = inlined_call_operand.hbm [shape: bf16[32,128], index: 0, kind: input, shape index: {}]   ;;  %s3120_s1 = inlined_call_operand.hbm [shape: bf16[128,128], index: 1, kind: input, shape index: {}]   ;;  %s3121_s2 = inlined_call_operand.vmem [shape: f32[1,128], index: 2, kind: input, shape index: {}]   ;;  %s3122_s3 = inlined_call_operand.vmem [shape: f32[1,128], index: 3, kind: input, shape index: {}]   ;;  %s3123_s4 = inlined_call_operand.hbm [shape: bf16[384,128], index: 4, kind: input, shape index: {}]   ;;  %s3124_s5 = inlined_call_operand.vmem [shape: f32[1,128], index: 5, kind: input, shape index: {}]   ;;  %s3125_s6 = inlined_call_operand.vmem [shape: f32[1,128], index: 6, kind: input, shape index: {}]   ;;  %s3126_s7 = inlined_call_operand.hbm [shape: bf16[384,256], index: 7, kind: input, shape index: {}]   ;;  %s3127_s8 = inlined_call_operand.vmem [shape: f32[1,256], index: 8, kind: input, shape index: {}]   ;;  %s3128_s9 = inlined_call_operand.vmem [shape: f32[1,256], index: 9, kind: input, shape index: {}]   ;;  %s3129_s10 = inlined_call_operand.hbm [shape: bf16[768,128], index: 10, kind: input, shape index: {}]   ;;  %s3130_s11 = inlined_call_operand.hbm [shape: f32[32,128], index: 11, kind: output, shape index: {}]  }
   0x1   :  { %17 = vsyncpa [#allocation6], 0 }
   0x2   :  { %18 = vsyncpa [#allocation9], 0 }
   0x3   :  { %19 = vsyncpa [#allocation4], 0  ;;  %s2625_s17 = smov [#allocation5]   ;;  %s2626_s19 = smov [#allocation8]  }
   0x4   :  { %s37_s18 = sshll.u32 %s2625_s17, 4  ;;  %s69_s20 = sshll.u32 %s2626_s19, 4  ;;  %s38_s18 = int_to_ptr.vmem [resolvable:$true] %s37_s18  ;;  %s2698_s20 = int_to_ptr.vmem [resolvable:$true] %s69_s20 }
   0x5   :  { %s2485_s23 = scalar_lea.hbm %s3120_s1, 1024 }
   0x6   :  { %p2486_p0 = scmp.ne.s32.totalorder %s3120_s1, %s2485_s23  ;;  %p2489_p1 = scmp.lt.u32.totalorder %s2485_s23, %s3120_s1 }
   0x8   :  { %p2491_p2 = pnand %p2489_p1, %p2486_p0 }
   0xa   :  { %2494 = shalt.err (!%p2491_p2)
}
   0xb   :  { %s2495_s28 = scalar_lea.vmem %s38_s18, 1024  ;;  %p2500_p4 = scmp.lt.s32.totalorder %s38_s18, %s38_s18 }
   0xc   :  { %p2496_p3 = scmp.ne.s32.totalorder %s38_s18, %s2495_s28  ;;  %p2501_p5 = scmp.lt.s32.totalorder %s2495_s28, %s2495_s28 }
   0xe   :  { %p2502_p6 = por %p2501_p5, %p2500_p4 }
  0x10   :  { %p2503_p7 = pnand %p2502_p6, %p2496_p3 }
  0x12   :  { %2506 = shalt.err (!%p2503_p7)
}
  0x13   :  { %s2627_s29 = smov 64   ;;  %s2628_s30 = smov 4  }
  0x14   :  { %43 = dma.hbm_to_vmem [thread:$0]  %s3120_s1, 1024, %s38_s18, [#allocation6], %s2627_s29, %s2627_s29, %s2628_s30  }
  0x15   :  { %s2507_s16 = scalar_lea.hbm %s3126_s7, 6144 }
  0x16   :  { %p2508_p8 = scmp.ne.s32.totalorder %s3126_s7, %s2507_s16  ;;  %p2511_p9 = scmp.lt.u32.totalorder %s2507_s16, %s3126_s7 }
  0x18   :  { %p2513_p10 = pnand %p2511_p9, %p2508_p8 }
  0x1a   :  { %2516 = shalt.err (!%p2513_p10)
}
  0x1b   :  { %s2517_s23 = scalar_lea.vmem %s2698_s20, 6144  ;;  %p2522_p12 = scmp.lt.s32.totalorder %s2698_s20, %s2698_s20 }
  0x1c   :  { %p2518_p11 = scmp.ne.s32.totalorder %s2698_s20, %s2517_s23  ;;  %p2523_p13 = scmp.lt.s32.totalorder %s2517_s23, %s2517_s23 }
  0x1e   :  { %p2524_p0 = por %p2523_p13, %p2522_p12 }
  0x20   :  { %p2525_p1 = pnand %p2524_p0, %p2518_p11 }
  0x22   :  { %2528 = shalt.err (!%p2525_p1)
}
  0x23   :  { %s2629_s1 = smov 128   ;;  %s2630_s18 = smov 8  }
  0x24   :  { %75 = dma.hbm_to_vmem [thread:$0]  %s3126_s7, 6144, %s2698_s20, [#allocation9], %s2629_s1, %s2629_s1, %s2630_s18  }
  0x25   :  { %s2631_s26 = smov [#allocation2]   ;;  %s2632_s28 = smov [#allocation7]  }
  0x26   :  { %s25_s27 = sshll.u32 %s2631_s26, 4  ;;  %s53_s12 = sshll.u32 %s2632_s28, 4  ;;  %s26_s27 = int_to_ptr.vmem [resolvable:$true] %s25_s27  ;;  %s2735_s12 = int_to_ptr.vmem [resolvable:$true] %s53_s12 }
  0x27   :  { %s2529_s15 = scalar_lea.hbm %s3119_s0, 256 }
  0x28   :  { %p2530_p2 = scmp.ne.s32.totalorder %s3119_s0, %s2529_s15  ;;  %p2533_p3 = scmp.lt.u32.totalorder %s2529_s15, %s3119_s0 }
  0x2a   :  { %p2535_p4 = pnand %p2533_p3, %p2530_p2 }
  0x2c   :  { %2538 = shalt.err (!%p2535_p4)
}
  0x2d   :  { %s2539_s7 = scalar_lea.vmem %s26_s27, 256  ;;  %p2544_p6 = scmp.lt.s32.totalorder %s26_s27, %s26_s27 }
  0x2e   :  { %p2540_p5 = scmp.ne.s32.totalorder %s26_s27, %s2539_s7  ;;  %p2545_p7 = scmp.lt.s32.totalorder %s2539_s7, %s2539_s7 }
  0x30   :  { %p2546_p8 = por %p2545_p7, %p2544_p6 }
  0x32   :  { %p2547_p9 = pnand %p2546_p8, %p2540_p5 }
  0x34   :  { %2550 = shalt.err (!%p2547_p9)
}
  0x35   :  { %31 = dma.hbm_to_vmem [thread:$0]  %s3119_s0, 256, %s26_s27, [#allocation3], %s2627_s29, %s2627_s29, %s2628_s30  }
  0x36   :  { %s2551_s25 = scalar_lea.hbm %s3123_s4, 3072 }
  0x37   :  { %p2552_p10 = scmp.ne.s32.totalorder %s3123_s4, %s2551_s25  ;;  %p2555_p11 = scmp.lt.u32.totalorder %s2551_s25, %s3123_s4 }
  0x39   :  { %p2557_p12 = pnand %p2555_p11, %p2552_p10 }
  0x3b   :  { %2560 = shalt.err (!%p2557_p12)
}
  0x3c   :  { %s2561_s15 = scalar_lea.vmem %s2735_s12, 3072  ;;  %p2566_p0 = scmp.lt.s32.totalorder %s2735_s12, %s2735_s12 }
  0x3d   :  { %p2562_p13 = scmp.ne.s32.totalorder %s2735_s12, %s2561_s15  ;;  %p2567_p1 = scmp.lt.s32.totalorder %s2561_s15, %s2561_s15 }
  0x3f   :  { %p2568_p2 = por %p2567_p1, %p2566_p0 }
  0x41   :  { %p2569_p3 = pnand %p2568_p2, %p2562_p13 }
  0x43   :  { %2572 = shalt.err (!%p2569_p3)
}
  0x44   :  { %59 = dma.hbm_to_vmem [thread:$0]  %s3123_s4, 3072, %s2735_s12, [#allocation6], %s2627_s29, %s2627_s29, %s2628_s30  }
  0x45   :  { %s2633_s16 = smov [#allocation10]   ;;  %s2573_s7 = scalar_lea.hbm %s3129_s10, 6144 }
  0x46   :  { %s85_s17 = sshll.u32 %s2633_s16, 4  ;;  %p2574_p4 = scmp.ne.s32.totalorder %s3129_s10, %s2573_s7  ;;  %s86_s17 = int_to_ptr.vmem [resolvable:$true] %s85_s17 }
  0x47   :  { %p2577_p5 = scmp.lt.u32.totalorder %s2573_s7, %s3129_s10 }
  0x49   :  { %p2579_p6 = pnand %p2577_p5, %p2574_p4 }
  0x4b   :  { %2582 = shalt.err (!%p2579_p6)
}
  0x4c   :  { %s2583_s25 = scalar_lea.vmem %s86_s17, 6144  ;;  %p2588_p8 = scmp.lt.s32.totalorder %s86_s17, %s86_s17 }
  0x4d   :  { %p2584_p7 = scmp.ne.s32.totalorder %s86_s17, %s2583_s25  ;;  %p2589_p9 = scmp.lt.s32.totalorder %s2583_s25, %s2583_s25 }
  0x4f   :  { %p2590_p10 = por %p2589_p9, %p2588_p8 }
  0x51   :  { %p2591_p11 = pnand %p2590_p10, %p2584_p7 }
  0x53   :  { %2594 = shalt.err (!%p2591_p11)
}
  0x54   :  { %91 = dma.hbm_to_vmem [thread:$0]  %s3129_s10, 6144, %s86_s17, [#allocation9], %s2627_s29, %s2627_s29, %s2628_s30  }
  0x55   :  { %2617 = dma.done.wait [#allocation3], 256  }
  0x56   :  { %2618 = vsyncadd [#allocation3], 4294967040 }
  0x57   :  { %2619 = dma.done.wait [#allocation6], 4096  }
  0x58   :  { %2620 = vsyncadd [#allocation6], 4294963200 }
  0x59   :  { %2621 = dma.done.wait [#allocation9], 12288  }
  0x5a   :  { %2622 = vsyncadd [#allocation9], 4294955008  ;;  %v2323_v0 = vld [vmem:[#allocation5] sm:$0xff]   ;;  %v2324_v1 = vld [vmem:[#allocation5 + $0x8] sm:$0xff]   ;;  %vm2634_vm5 = vmmov 1  }
  0x5b   :  { %2246 = vmatprep.subr.bf16.mxu0 %v2323_v0  ;;  %v2325_v2 = vld [vmem:[#allocation5 + $0x10] sm:$0xff]   ;;  %v2326_v3 = vld [vmem:[#allocation5 + $0x18] sm:$0xff]   ;;  %v2327_v5 = vld [vmem:[#allocation5 + $0x20] sm:$0xff]  }
  0x5c   :  { %2247 = vmatpush3.bf16.msra.mxu0 %v2323_v0  ;;  %v2331_v4 = vld [vmem:[#allocation2] sm:$0xff]   ;;  %v2328_v6 = vld [vmem:[#allocation5 + $0x28] sm:$0xff]   ;;  %v2330_v8 = vld [vmem:[#allocation5 + $0x38] sm:$0xff]  }
  0x5d   :  { %2248 = vmatprep.subr.bf16.mxu0 %v2324_v1  ;;  %2262 = vmatprep.mubr.bf16.mxu0 %v2331_v4  ;;  %v2329_v7 = vld [vmem:[#allocation5 + $0x30] sm:$0xff]   ;;  %v2332_v9 = vld [vmem:[#allocation2 + $0x8] sm:$0xff]   ;;  %v2333_v10 = vld [vmem:[#allocation7 + $0x40] sm:$0xff]  }
  0x5e   :  { %v2334_v11 = vld [vmem:[#allocation7] sm:$0xff]   ;;  %2124 = vmatprep.subr.bf16.mxu1 %v2333_v10  ;;  %v2336_v13 = vld [vmem:[#allocation7 + $0x48] sm:$0xff]   ;;  %v2339_v16 = vld [vmem:[#allocation7 + $0x50] sm:$0xff]  }
  0x5f   :  { %v2335_v12 = vld [vmem:[#allocation7 + $0x80] sm:$0xff]   ;;  %2125 = vmatpush3.bf16.msra.mxu1 %v2334_v11  ;;  %v2337_v14 = vld [vmem:[#allocation7 + $0x8] sm:$0xff]   ;;  %v2340_v17 = vld [vmem:[#allocation7 + $0x10] sm:$0xff]  }
  0x60   :  { %2249 = vmatpush3.bf16.msra.mxu0 %v2324_v1  ;;  %v2338_v15 = vld [vmem:[#allocation7 + $0x88] sm:$0xff]   ;;  %2126 = vmatprep.subr.bf16.mxu1 %v2336_v13  ;;  %v2341_v18 = vld [vmem:[#allocation7 + $0x90] sm:$0xff]   ;;  %v2342_v19 = vld [vmem:[#allocation7 + $0x58] sm:$0xff]  }
  0x61   :  { %2250 = vmatprep.subr.bf16.mxu0 %v2325_v2  ;;  %v2343_v20 = vld [vmem:[#allocation7 + $0x18] sm:$0xff]   ;;  %v2345_v22 = vld [vmem:[#allocation7 + $0x60] sm:$0xff]   ;;  %v2348_v25 = vld [vmem:[#allocation7 + $0x68] sm:$0xff]  }
  0x62   :  { %v2344_v21 = vld [vmem:[#allocation7 + $0x98] sm:$0xff]   ;;  %v2346_v23 = vld [vmem:[#allocation7 + $0x20] sm:$0xff]   ;;  %v2349_v26 = vld [vmem:[#allocation7 + $0x28] sm:$0xff]  }
  0x63   :  { %2127 = vmatpush3.bf16.msra.mxu1 %v2337_v14  ;;  %v2347_v24 = vld [vmem:[#allocation7 + $0xa0] sm:$0xff]   ;;  %v2350_v27 = vld [vmem:[#allocation7 + $0xa8] sm:$0xff]   ;;  %v2351_v28 = vld [vmem:[#allocation7 + $0x70] sm:$0xff]  }
  0x64   :  { %2251 = vmatpush3.bf16.msra.mxu0 %v2325_v2  ;;  %2128 = vmatprep.subr.bf16.mxu1 %v2339_v16  ;;  %v2352_v29 = vld [vmem:[#allocation7 + $0x30] sm:$0xff]   ;;  %v2354_v31 = vld [vmem:[#allocation7 + $0x78] sm:$0xff]  }
  0x65   :  { %2252 = vmatprep.subr.bf16.mxu0 %v2326_v3  ;;  %v2353_v30 = vld [vmem:[#allocation7 + $0xb0] sm:$0xff]   ;;  %v2355_v32 = vld [vmem:[#allocation7 + $0x38] sm:$0xff]  }
  0x66   :  { %v2356_v33 = vld [vmem:[#allocation7 + $0xb8] sm:$0xff]  }
  0x67   :  { %2129 = vmatpush3.bf16.msra.mxu1 %v2340_v17 }
  0x68   :  { %2253 = vmatpush3.bf16.msra.mxu0 %v2326_v3  ;;  %2130 = vmatprep.subr.bf16.mxu1 %v2342_v19 }
  0x69   :  { %2254 = vmatprep.subr.bf16.mxu0 %v2327_v5 }
  0x6b   :  { %2131 = vmatpush3.bf16.msra.mxu1 %v2343_v20 }
  0x6c   :  { %2255 = vmatpush3.bf16.msra.mxu0 %v2327_v5  ;;  %2132 = vmatprep.subr.bf16.mxu1 %v2345_v22 }
  0x6d   :  { %2256 = vmatprep.subr.bf16.mxu0 %v2328_v6 }
  0x6f   :  { %2133 = vmatpush3.bf16.msra.mxu1 %v2346_v23 }
  0x70   :  { %2257 = vmatpush3.bf16.msra.mxu0 %v2328_v6  ;;  %2134 = vmatprep.subr.bf16.mxu1 %v2348_v25  ;;  %v108_v6 = vlaneseq }
  0x71   :  { %2258 = vmatprep.subr.bf16.mxu0 %v2329_v7 }
  0x73   :  { %2135 = vmatpush3.bf16.msra.mxu1 %v2349_v26 }
  0x74   :  { %2259 = vmatpush3.bf16.msra.mxu0 %v2329_v7  ;;  %2136 = vmatprep.subr.bf16.mxu1 %v2351_v28  ;;  %v2787_v7 = vshrl.u32 %v108_v6, 7  ;;  %v2374_v6 = vld [vmem:[#allocation8 + $0x54] ss:$8 sps:$4 sm:$0xff]  }
  0x75   :  { %2260 = vmatprep.subr.bf16.mxu0 %v2330_v8 }
  0x76   :  { %v110_v13 = vadd.s32 8, %v2787_v7  ;;  %v112_v14 = vadd.s32 24, %v2787_v7  ;;  %vm360_vm0 = vcmp.lt.s32.totalorder %v2787_v7, 1  ;;  %vm383_vm1 = vcmp.lt.s32.totalorder %v2787_v7, 7 }
  0x77   :  { %2137 = vmatpush3.bf16.msra.mxu1 %v2352_v29 }
  0x78   :  { %2261 = vmatpush3.bf16.msra.mxu0 %v2330_v8  ;;  %2138 = vmatprep.subr.bf16.mxu1 %v2354_v31  ;;  %v329_v8 = vld [vmem:[%s3121_s2] sm:$0x1]  ;;  %v124_v22 = vand.u32 15, %v110_v13 }
  0x79   :  { %2266 = vmatprep.subr.bf16.mxu0 %v2335_v12  ;;  %v2378_v13 = vld [vmem:[#allocation8 + $0x70] ss:$8 sps:$4 sm:$0xff]  }
  0x7a   :  { %vm2805_vm3 = vcmp.ne.s32.totalorder %v124_v22, 15  ;;  %v2395_v22 = vld [vmem:[#allocation8 + $0xc4] ss:$8 sps:$4 sm:$0xff]  }
  0x7b   :  { %2263 = vmatmul.mubr.bf16.vlgmr.msra.gmra.mrb[0].mxu0 %v2332_v9  ;;  %2139 = vmatpush3.bf16.msra.mxu1 %v2355_v32  ;;  %v2793_v9 = vsub.s32 0, %v2787_v7  ;;  %v111_v32 = vadd.s32 16, %v2787_v7  ;;  %vm2830_vm7 = vmpackc.low %vm2805_vm3, %vm2634_vm5 }
  0x7c   :  { %2267 = vmatpush3.bf16.msra.mxu0 %v2335_v12  ;;  %v333_v12 = vld [vmem:[%s3122_s3] sm:$0x1] }
  0x7d   :  { %2268 = vmatprep.subr.bf16.mxu0 %v2338_v15 }
  0x80   :  { %2269 = vmatpush3.bf16.msra.mxu0 %v2338_v15 }
  0x81   :  { %2270 = vmatprep.subr.bf16.mxu0 %v2341_v18 }
  0x84   :  { %2271 = vmatpush3.bf16.msra.mxu0 %v2341_v18 }
  0x85   :  { %2272 = vmatprep.subr.bf16.mxu0 %v2344_v21 }
  0x88   :  { %2273 = vmatpush3.bf16.msra.mxu0 %v2344_v21  ;;  %v117_v21 = vand.u32 15, %v2787_v7 }
  0x89   :  { %2274 = vmatprep.subr.bf16.mxu0 %v2347_v24 }
  0x8a   :  { %vm161_vm2 = vcmp.ne.s32.totalorder %v117_v21, 0  ;;  %v2390_v21 = vld [vmem:[#allocation8 + $0xb0] ss:$8 sps:$4 sm:$0xff]  }
  0x8b   :  { %vm2817_vm6 = vmpackc.low %vm2634_vm5, %vm161_vm2 }
  0x8c   :  { %2275 = vmatpush3.bf16.msra.mxu0 %v2347_v24  ;;  %v138_v24 = vand.u32 15, %v112_v14  ;;  %v2383_v14 = vld [vmem:[#allocation8 + $0x84] ss:$8 sps:$4 sm:$0xff]  }
  0x8d   :  { %2276 = vmatprep.subr.bf16.mxu0 %v2350_v27 }
  0x8e   :  { %vm2809_vm4 = vcmp.ne.s32.totalorder %v138_v24, 15  ;;  %v2398_v24 = vld [vmem:[#allocation8 + $0xd4] ss:$8 sps:$4 sm:$0xff]  }
  0x8f   :  { %vm2841_vm8 = vmpackc.low %vm2809_vm4, %vm2634_vm5 }
  0x90   :  { %2277 = vmatpush3.bf16.msra.mxu0 %v2350_v27 }
  0x91   :  { %2278 = vmatprep.subr.bf16.mxu0 %v2353_v30 }
  0x94   :  { %2279 = vmatpush3.bf16.msra.mxu0 %v2353_v30  ;;  %v2407_v30 = vld [vmem:[#allocation8 + $0x104] ss:$8 sps:$4 sm:$0xff]  }
  0x95   :  { %2280 = vmatprep.subr.bf16.mxu0 %v2356_v33 }
  0x98   :  { %2281 = vmatpush3.bf16.msra.mxu0 %v2356_v33 }
 0x14e   :  { %v2264_v34 = vpop.f32.mrb[0].mxu0 }
 0x14f   :  { %v283_v35 = vpop.f32.mrb[1].mxu0  ;;  %v300_v39 = vmax.f32 %v2264_v34, 0.0 }
 0x150   :  { %v298_v36 = vmax.f32 %v283_v35, 0.0  ;;  %v2265_v37 = vpop.f32.mrb[2].mxu0 }
 0x151   :  { %v286_v38 = vpop.f32.mrb[3].mxu0  ;;  %v301_v42 = vmax.f32 %v2265_v37, 0.0  ;;  %v314_v45 = vmul.f32 %v300_v39, %v300_v39 }
 0x152   :  { %v299_v40 = vmax.f32 %v286_v38, 0.0  ;;  %v312_v41 = vmul.f32 %v298_v36, %v298_v36 }
 0x153   :  { %v315_v48 = vmul.f32 %v301_v42, %v301_v42 }
 0x154   :  { %v302_v43 = vadd.f32 %v299_v40, %v298_v36  ;;  %v313_v44 = vmul.f32 %v299_v40, %v299_v40 }
 0x156   :  { %v303_v46 = vadd.f32 %v302_v43, %v300_v39  ;;  %v316_v47 = vadd.f32 %v313_v44, %v312_v41 }
 0x158   :  { %v304_v49 = vadd.f32 %v303_v46, %v301_v42  ;;  %v317_v50 = vadd.f32 %v316_v47, %v314_v45 }
 0x15a   :  { %v305_v51 = vrot.slane %v304_v49, 4  ;;  %v318_v52 = vadd.f32 %v317_v50, %v315_v48 }
 0x15c   :  { %v306_v53 = vadd.f32 %v305_v51, %v304_v49  ;;  %v319_v54 = vrot.slane %v318_v52, 4  ;;  %v131_v49 = vand.u32 15, %v111_v32 }
 0x15e   :  { %v307_v55 = vrot.slane %v306_v53, 2  ;;  %v320_v56 = vadd.f32 %v319_v54, %v318_v52  ;;  %vm163_vm9 = vcmp.ne.s32.totalorder %v131_v49, 0 }
 0x15f   :  { %vm2856_vm10 = vmpackc.low %vm2634_vm5, %vm163_vm9 }
 0x160   :  { %v308_v57 = vadd.f32 %v307_v55, %v306_v53  ;;  %v321_v58 = vrot.slane %v320_v56, 2 }
 0x162   :  { %v309_v59 = vrot.slane %v308_v57, 1  ;;  %v322_v60 = vadd.f32 %v321_v58, %v320_v56 }
 0x164   :  { %v310_v61 = vadd.f32 %v309_v59, %v308_v57  ;;  %v323_v62 = vrot.slane %v322_v60, 1  ;;  %v2476_v59 = vld [vmem:[#allocation10 + $0xb8] sm:$0xff]  }
 0x166   :  { %v311_v63 = vmul.f32 0.03125, %v310_v61  ;;  %v324_v0 = vadd.f32 %v323_v62, %v322_v60  ;;  %v2359_v60 = vld [vmem:[#allocation8 + $0x4] ss:$8 sps:$4 sm:$0xff]   ;;  %v2357_v61 = vld [vmem:[#allocation8] ss:$8 sps:$4 sm:$0xff]  }
 0x167   :  { %1070 = vmatprep.subr.bf16.mxu1 %v2359_v60  ;;  %v2362_v62 = vld [vmem:[#allocation8 + $0x14] ss:$8 sps:$4 sm:$0xff]  }
 0x168   :  { %v325_v1 = vmul.f32 0.03125, %v324_v0  ;;  %v326_v2 = vmul.f32 %v311_v63, %v311_v63  ;;  %v2365_v0 = vld [vmem:[#allocation8 + $0x24] ss:$8 sps:$4 sm:$0xff]  }
 0x16a   :  { %v327_v3 = vsub.f32 %v325_v1, %v326_v2  ;;  %v2363_v1 = vld [vmem:[#allocation8 + $0x20] ss:$8 sps:$4 sm:$0xff]   ;;  %v2368_v2 = vld [vmem:[#allocation8 + $0x34] ss:$8 sps:$4 sm:$0xff]  }
 0x16c   :  { %v328_v4 = vmax.f32 %v327_v3, 0.0  ;;  %v2366_v3 = vld [vmem:[#allocation8 + $0x30] ss:$8 sps:$4 sm:$0xff]  }
 0x16e   :  { %v330_v5 = vadd.f32 1e-05, %v328_v4  ;;  %v2371_v4 = vld [vmem:[#allocation8 + $0x44] ss:$8 sps:$4 sm:$0xff]  }
 0x170   :  { %2477 = vrsqrt.f32 %v330_v5  ;;  %v2369_v5 = vld [vmem:[#allocation8 + $0x40] ss:$8 sps:$4 sm:$0xff]  }
 0x17a   :  { %v2478_v10 = vpop.eup %2477 }
 0x17b   :  { %v332_v11 = vmul.f32 %v2478_v10, %v329_v8  ;;  %v2372_v8 = vld [vmem:[#allocation8 + $0x50] ss:$8 sps:$4 sm:$0xff]   ;;  %v2377_v10 = vld [vmem:[#allocation8 + $0x64] ss:$8 sps:$4 sm:$0xff]  }
 0x17d   :  { %v340_v15 = vrot.slane %v332_v11, %v2793_v9  ;;  %v334_v16 = vmul.f32 %v332_v11, %v311_v63  ;;  %v2360_v63 = vld [vmem:[#allocation8 + $0x10] ss:$8 sps:$4 sm:$0xff]   ;;  %v2375_v11 = vld [vmem:[#allocation8 + $0x60] ss:$8 sps:$4 sm:$0xff]  }
 0x17f   :  { %v343_v17 = vmul.f32 %v340_v15, %v299_v40  ;;  %v335_v18 = vsub.f32 %v333_v12, %v334_v16  ;;  %v342_v19 = vmul.f32 %v340_v15, %v298_v36  ;;  %v345_v20 = vmul.f32 %v340_v15, %v301_v42  ;;  %v2380_v12 = vld [vmem:[#allocation8 + $0x74] ss:$8 sps:$4 sm:$0xff]  }
 0x180   :  { %v344_v23 = vmul.f32 %v340_v15, %v300_v39  ;;  %v2381_v15 = vld [vmem:[#allocation8 + $0x80] ss:$8 sps:$4 sm:$0xff]   ;;  %v2386_v16 = vld [vmem:[#allocation8 + $0x94] ss:$8 sps:$4 sm:$0xff]  }
 0x181   :  { %v350_v25 = vrot.slane %v335_v18, %v2793_v9  ;;  %v2389_v18 = vld [vmem:[#allocation8 + $0xa4] ss:$8 sps:$4 sm:$0xff]  }
 0x183   :  { %v352_v26 = vadd.f32 %v350_v25, %v342_v19  ;;  %v353_v27 = vadd.f32 %v350_v25, %v343_v17  ;;  %v355_v28 = vadd.f32 %v350_v25, %v345_v20  ;;  %v354_v29 = vadd.f32 %v350_v25, %v344_v23  ;;  %v2384_v17 = vld [vmem:[#allocation8 + $0x90] ss:$8 sps:$4 sm:$0xff]   ;;  %v2387_v19 = vld [vmem:[#allocation8 + $0xa0] ss:$8 sps:$4 sm:$0xff]   ;;  %v2392_v20 = vld [vmem:[#allocation8 + $0xb4] ss:$8 sps:$4 sm:$0xff]  }
 0x184   :  { %v2393_v23 = vld [vmem:[#allocation8 + $0xc0] ss:$8 sps:$4 sm:$0xff]   ;;  %v2396_v25 = vld [vmem:[#allocation8 + $0xd0] ss:$8 sps:$4 sm:$0xff]  }
 0x185   :  { %v356_v33 = vrot.slane %v352_v26, 7  ;;  %v357_v34 = vrot.slane %v353_v27, 7  ;;  %v379_v35 = vrot.slane %v352_v26, 1  ;;  %v380_v36 = vrot.slane %v353_v27, 1 }
 0x186   :  { %v402_v37 = vpack.c.bf16 %v353_v27, %v352_v26  ;;  %v359_v38 = vrot.slane %v355_v28, 7  ;;  %v381_v39 = vrot.slane %v354_v29, 1  ;;  %v403_v40 = vpack.c.bf16 %v355_v28, %v354_v29  ;;  %v2401_v26 = vld [vmem:[#allocation8 + $0xe4] ss:$8 sps:$4 sm:$0xff]   ;;  %v2399_v27 = vld [vmem:[#allocation8 + $0xe0] ss:$8 sps:$4 sm:$0xff]  }
 0x187   :  { %v363_v41 = vsel %vm360_vm0, %v356_v33, %v357_v34  ;;  %v386_v43 = vsel %vm383_vm1, %v379_v35, %v380_v36  ;;  %v382_v44 = vrot.slane %v355_v28, 1  ;;  %v358_v45 = vrot.slane %v354_v29, 7  ;;  %v2402_v28 = vld [vmem:[#allocation8 + $0xf0] ss:$8 sps:$4 sm:$0xff]   ;;  %v2404_v29 = vld [vmem:[#allocation8 + $0xf4] ss:$8 sps:$4 sm:$0xff]  }
 0x188   :  { %628 = vmatprep.mubr.bf16.mxu1 %v402_v37  ;;  %v364_v46 = vsel %vm360_vm0, %v359_v38, %v356_v33  ;;  %v385_v47 = vsel %vm383_vm1, %v380_v36, %v381_v39 }
 0x189   :  { %v1971_v50 = vpack.c.bf16 %v363_v41, %v364_v46  ;;  %v1977_v51 = vpack.c.bf16 %v385_v47, %v386_v43  ;;  %v384_v52 = vsel %vm383_vm1, %v381_v39, %v382_v44  ;;  %v387_v53 = vsel %vm383_vm1, %v382_v44, %v379_v35 }
 0x18a   :  { %v1980_v55 = vpack.c.bf16 %v387_v53, %v384_v52  ;;  %v361_v56 = vsel %vm360_vm0, %v358_v45, %v359_v38  ;;  %v362_v57 = vsel %vm360_vm0, %v357_v34, %v358_v45 }
 0x18b   :  { %1972 = vmatmul.mubr.msk.bf16.vlgmr.msra.gmra.mrb[0].mxu1 %vm2817_vm6, %v1971_v50  ;;  %2282 = vmatprep.mubr.msk.bf16.mxu0 %vm2830_vm7, %v1977_v51  ;;  %v1974_v58 = vpack.c.bf16 %v361_v56, %v362_v57 }
 0x18c   :  { %636 = vmatprep.mubr.bf16.mxu1 %v403_v40  ;;  %2283 = vmatmul.mubr.msk.bf16.vlgmr.msra.gmra.mrb[4].mxu0 %vm2841_vm8, %v1980_v55 }
 0x18d   :  { %1071 = vmatpush1.bf16.msra.mxu1 %v2357_v61 }
 0x18e   :  { %1072 = vmatprep.subr.bf16.mxu1 %v2362_v62 }
 0x191   :  { %1073 = vmatpush1.bf16.msra.mxu1 %v2360_v63 }
 0x192   :  { %1074 = vmatprep.subr.bf16.mxu1 %v2365_v0 }
 0x193   :  { %1975 = vmatmul.mubr.msk.bf16.gmra.mrb[4].mxu1 %vm2856_vm10, %v1974_v58 }
 0x195   :  { %1075 = vmatpush1.bf16.msra.mxu1 %v2363_v1 }
 0x196   :  { %1076 = vmatprep.subr.bf16.mxu1 %v2368_v2 }
 0x199   :  { %1077 = vmatpush1.bf16.msra.mxu1 %v2366_v3 }
 0x19a   :  { %1078 = vmatprep.subr.bf16.mxu1 %v2371_v4 }
 0x19d   :  { %1079 = vmatpush1.bf16.msra.mxu1 %v2369_v5 }
 0x19e   :  { %1080 = vmatprep.subr.bf16.mxu1 %v2374_v6 }
 0x1a1   :  { %1081 = vmatpush1.bf16.msra.mxu1 %v2372_v8 }
 0x1a2   :  { %1082 = vmatprep.subr.bf16.mxu1 %v2377_v10 }
 0x1a5   :  { %1083 = vmatpush1.bf16.msra.mxu1 %v2375_v11 }
 0x1a6   :  { %1084 = vmatprep.subr.bf16.mxu1 %v2380_v12 }
 0x1a9   :  { %1085 = vmatpush1.bf16.msra.mxu1 %v2378_v13 }
 0x1aa   :  { %1086 = vmatprep.subr.bf16.mxu1 %v2383_v14 }
 0x1ad   :  { %1087 = vmatpush1.bf16.msra.mxu1 %v2381_v15 }
 0x1ae   :  { %1088 = vmatprep.subr.bf16.mxu1 %v2386_v16 }
 0x1b1   :  { %1089 = vmatpush1.bf16.msra.mxu1 %v2384_v17 }
 0x1b2   :  { %1090 = vmatprep.subr.bf16.mxu1 %v2389_v18 }
 0x1b5   :  { %1091 = vmatpush1.bf16.msra.mxu1 %v2387_v19 }
 0x1b6   :  { %1092 = vmatprep.subr.bf16.mxu1 %v2392_v20 }
 0x1b9   :  { %1093 = vmatpush1.bf16.msra.mxu1 %v2390_v21 }
 0x1ba   :  { %1094 = vmatprep.subr.bf16.mxu1 %v2395_v22 }
 0x1bd   :  { %1095 = vmatpush1.bf16.msra.mxu1 %v2393_v23 }
 0x1be   :  { %1096 = vmatprep.subr.bf16.mxu1 %v2398_v24 }
 0x1c1   :  { %1097 = vmatpush1.bf16.msra.mxu1 %v2396_v25  ;;  %v725_v25 = vld [vmem:[%s3124_s5] sm:$0x1] }
 0x1c2   :  { %1098 = vmatprep.subr.bf16.mxu1 %v2401_v26 }
 0x1c5   :  { %1099 = vmatpush1.bf16.msra.mxu1 %v2399_v27 }
 0x1c6   :  { %1100 = vmatprep.subr.bf16.mxu1 %v2404_v29 }
 0x1c9   :  { %1101 = vmatpush1.bf16.msra.mxu1 %v2402_v28  ;;  %v729_v28 = vld [vmem:[%s3125_s6] sm:$0x1] }
 0x1ca   :  { %1123 = vmatprep.subr.bf16.mxu1 %v2407_v30 }
 0x25e   :  { %v2140_v31 = vpop.f32.mrb[0].mxu1 }
 0x25f   :  { %v2141_v32 = vpop.f32.mrb[1].mxu1  ;;  %v2284_v33 = vpop.f32.mrb[4].mxu0 }
 0x260   :  { %v2142_v34 = vadd.f32 %v2141_v32, %v2140_v31  ;;  %v2143_v35 = vpop.f32.mrb[2].mxu1  ;;  %v679_v36 = vpop.f32.mrb[5].mxu0 }
 0x261   :  { %v2144_v37 = vpop.f32.mrb[3].mxu1  ;;  %v2285_v38 = vpop.f32.mrb[6].mxu0 }
 0x262   :  { %v680_v39 = vadd.f32 %v2142_v34, %v679_v36  ;;  %v2145_v40 = vadd.f32 %v2144_v37, %v2143_v35  ;;  %v682_v41 = vpop.f32.mrb[7].mxu0 }
 0x264   :  { %v694_v43 = vmax.f32 %v680_v39, 0.0  ;;  %v683_v44 = vadd.f32 %v2145_v40, %v682_v41 }
 0x266   :  { %v695_v45 = vmax.f32 %v683_v44, 0.0  ;;  %v2146_v46 = vpop.f32.mrb[4].mxu1  ;;  %v708_v49 = vmul.f32 %v694_v43, %v694_v43 }
 0x267   :  { %v2147_v47 = vpop.f32.mrb[5].mxu1 }
 0x268   :  { %v698_v50 = vadd.f32 %v695_v45, %v694_v43  ;;  %v709_v51 = vmul.f32 %v695_v45, %v695_v45  ;;  %v2148_v52 = vadd.f32 %v2147_v47, %v2146_v46  ;;  %v2149_v53 = vpop.f32.mrb[6].mxu1 }
 0x269   :  { %v2150_v55 = vpop.f32.mrb[7].mxu1 }
 0x26a   :  { %v712_v56 = vadd.f32 %v709_v51, %v708_v49  ;;  %v688_v57 = vadd.f32 %v2284_v33, %v2148_v52  ;;  %v2151_v58 = vadd.f32 %v2150_v55, %v2149_v53 }
 0x26c   :  { %v696_v60 = vmax.f32 %v688_v57, 0.0  ;;  %v691_v61 = vadd.f32 %v2285_v38, %v2151_v58 }
 0x26e   :  { %v699_v62 = vadd.f32 %v698_v50, %v696_v60  ;;  %v710_v63 = vmul.f32 %v696_v60, %v696_v60  ;;  %v697_v0 = vmax.f32 %v691_v61, 0.0  ;;  %v2410_v61 = vld [vmem:[#allocation8 + $0x114] ss:$8 sps:$4 sm:$0xff]  }
 0x270   :  { %v713_v1 = vadd.f32 %v712_v56, %v710_v63  ;;  %v700_v2 = vadd.f32 %v699_v62, %v697_v0  ;;  %v711_v3 = vmul.f32 %v697_v0, %v697_v0 }
 0x272   :  { %v701_v4 = vrot.slane %v700_v2, 4  ;;  %v714_v5 = vadd.f32 %v713_v1, %v711_v3 }
 0x274   :  { %v702_v6 = vadd.f32 %v701_v4, %v700_v2  ;;  %v715_v8 = vrot.slane %v714_v5, 4  ;;  %v2408_v4 = vld [vmem:[#allocation8 + $0x110] ss:$8 sps:$4 sm:$0xff]  }
 0x276   :  { %v703_v10 = vrot.slane %v702_v6, 2  ;;  %v716_v11 = vadd.f32 %v715_v8, %v714_v5  ;;  %v2411_v8 = vld [vmem:[#allocation8 + $0x120] ss:$8 sps:$4 sm:$0xff]  }
 0x278   :  { %v704_v12 = vadd.f32 %v703_v10, %v702_v6  ;;  %v717_v13 = vrot.slane %v716_v11, 2  ;;  %v2413_v6 = vld [vmem:[#allocation8 + $0x124] ss:$8 sps:$4 sm:$0xff]   ;;  %v2416_v10 = vld [vmem:[#allocation8 + $0x134] ss:$8 sps:$4 sm:$0xff]  }
 0x27a   :  { %v705_v14 = vrot.slane %v704_v12, 1  ;;  %v718_v15 = vadd.f32 %v717_v13, %v716_v11  ;;  %v2414_v11 = vld [vmem:[#allocation8 + $0x130] ss:$8 sps:$4 sm:$0xff]   ;;  %v2419_v13 = vld [vmem:[#allocation8 + $0x144] ss:$8 sps:$4 sm:$0xff]  }
 0x27c   :  { %v706_v16 = vadd.f32 %v705_v14, %v704_v12  ;;  %v719_v17 = vrot.slane %v718_v15, 1  ;;  %v2635_v12 = vmov 0   ;;  %v2417_v14 = vld [vmem:[#allocation8 + $0x140] ss:$8 sps:$4 sm:$0xff]  }
 0x27e   :  { %v707_v18 = vmul.f32 0.03125, %v706_v16  ;;  %v720_v19 = vadd.f32 %v719_v17, %v718_v15  ;;  %v2422_v15 = vld [vmem:[#allocation8 + $0x154] ss:$8 sps:$4 sm:$0xff]   ;;  %v2420_v16 = vld [vmem:[#allocation8 + $0x150] ss:$8 sps:$4 sm:$0xff]  }
 0x27f   :  { %v2425_v17 = vld [vmem:[#allocation8 + $0x164] ss:$8 sps:$4 sm:$0xff]  }
 0x280   :  { %v721_v20 = vmul.f32 0.03125, %v720_v19  ;;  %v722_v21 = vmul.f32 %v707_v18, %v707_v18  ;;  %v2428_v19 = vld [vmem:[#allocation8 + $0x174] ss:$8 sps:$4 sm:$0xff]  }
 0x282   :  { %v723_v22 = vsub.f32 %v721_v20, %v722_v21  ;;  %v2426_v20 = vld [vmem:[#allocation8 + $0x170] ss:$8 sps:$4 sm:$0xff]   ;;  %v2429_v21 = vld [vmem:[#allocation10 + $0x40] sm:$0xff]  }
 0x283   :  { %2162 = vmatprep.subr.bf16.mxu0 %v2429_v21 }
 0x284   :  { %v724_v23 = vmax.f32 %v723_v22, 0.0  ;;  %v2430_v22 = vld [vmem:[#allocation10] sm:$0xff]  }
 0x285   :  { %2163 = vmatpush3.bf16.msra.mxu0 %v2430_v22 }
 0x286   :  { %v726_v24 = vadd.f32 1e-05, %v724_v23  ;;  %v2894_v23 = vld [vmem:[#allocation10 + $0x140] sm:$0xff]  }
 0x288   :  { %2479 = vrsqrt.f32 %v726_v24  ;;  %v2896_v24 = vld [vmem:[#allocation10 + $0x100] sm:$0xff]  }
 0x292   :  { %v2480_v26 = vpop.eup %2479 }
 0x293   :  { %v728_v27 = vmul.f32 %v2480_v26, %v725_v25  ;;  %v2433_v25 = vld [vmem:[#allocation10 + $0x48] sm:$0xff]  }
 0x294   :  { %v2434_v26 = vld [vmem:[#allocation10 + $0x8] sm:$0xff]   ;;  %2164 = vmatprep.subr.bf16.mxu0 %v2433_v25 }
 0x295   :  { %v730_v29 = vmul.f32 %v728_v27, %v707_v18  ;;  %v736_v30 = vrot.slane %v728_v27, %v2793_v9  ;;  %v2423_v18 = vld [vmem:[#allocation8 + $0x160] ss:$8 sps:$4 sm:$0xff]   ;;  %2165 = vmatpush3.bf16.msra.mxu0 %v2434_v26 }
 0x296   :  { %v2900_v27 = vld [vmem:[#allocation10 + $0x148] sm:$0xff]  }
 0x297   :  { %v731_v31 = vsub.f32 %v729_v28, %v730_v29  ;;  %v741_v32 = vmul.f32 %v736_v30, %v697_v0  ;;  %v738_v33 = vmul.f32 %v736_v30, %v694_v43  ;;  %v739_v34 = vmul.f32 %v736_v30, %v695_v45  ;;  %v2405_v45 = vld [vmem:[#allocation8 + $0x100] ss:$8 sps:$4 sm:$0xff]   ;;  %v2437_v29 = vld [vmem:[#allocation10 + $0x50] sm:$0xff]  }
 0x298   :  { %v740_v35 = vmul.f32 %v736_v30, %v696_v60  ;;  %v2902_v28 = vld [vmem:[#allocation10 + $0x108] sm:$0xff]   ;;  %v2438_v30 = vld [vmem:[#allocation10 + $0x10] sm:$0xff]   ;;  %2166 = vmatprep.subr.bf16.mxu0 %v2437_v29 }
 0x299   :  { %v746_v36 = vrot.slane %v731_v31, %v2793_v9  ;;  %v2906_v31 = vld [vmem:[#allocation10 + $0x150] sm:$0xff]   ;;  %2167 = vmatpush3.bf16.msra.mxu0 %v2438_v30 }
 0x29b   :  { %v751_v37 = vadd.f32 %v746_v36, %v741_v32  ;;  %v748_v38 = vadd.f32 %v746_v36, %v738_v33  ;;  %v749_v39 = vadd.f32 %v746_v36, %v739_v34  ;;  %v750_v40 = vadd.f32 %v746_v36, %v740_v35  ;;  %v2908_v32 = vld [vmem:[#allocation10 + $0x110] sm:$0xff]   ;;  %v2441_v33 = vld [vmem:[#allocation10 + $0x58] sm:$0xff]  }
 0x29c   :  { %v2442_v34 = vld [vmem:[#allocation10 + $0x18] sm:$0xff]   ;;  %2168 = vmatprep.subr.bf16.mxu0 %v2441_v33 }
 0x29d   :  { %v755_v41 = vrot.slane %v751_v37, 7  ;;  %v752_v44 = vrot.slane %v748_v38, 7  ;;  %v753_v46 = vrot.slane %v749_v39, 7  ;;  %v766_v47 = vrot.slane %v748_v38, 1  ;;  %v2912_v35 = vld [vmem:[#allocation10 + $0x158] sm:$0xff]   ;;  %2169 = vmatpush3.bf16.msra.mxu0 %v2442_v34 }
 0x29e   :  { %v767_v49 = vrot.slane %v749_v39, 1  ;;  %v780_v50 = vpack.c.bf16 %v749_v39, %v748_v38  ;;  %v768_v51 = vrot.slane %v750_v40, 1  ;;  %v781_v52 = vpack.c.bf16 %v751_v37, %v750_v40  ;;  %v2914_v36 = vld [vmem:[#allocation10 + $0x118] sm:$0xff]   ;;  %v2446_v38 = vld [vmem:[#allocation10 + $0x20] sm:$0xff]  }
 0x29f   :  { %v758_v53 = vsel %vm360_vm0, %v752_v44, %v753_v46  ;;  %v759_v43 = vsel %vm360_vm0, %v755_v41, %v752_v44  ;;  %v754_v55 = vrot.slane %v750_v40, 7  ;;  %v769_v56 = vrot.slane %v751_v37, 1  ;;  %v2445_v37 = vld [vmem:[#allocation10 + $0x60] sm:$0xff]   ;;  %v2450_v44 = vld [vmem:[#allocation10 + $0x28] sm:$0xff]  }
 0x2a0   :  { %v772_v57 = vsel %vm383_vm1, %v766_v47, %v767_v49  ;;  %1102 = vmatprep.mubr.bf16.mxu1 %v780_v50  ;;  %v2031_v58 = vpack.c.bf16 %v758_v53, %v759_v43  ;;  %v771_v60 = vsel %vm383_vm1, %v767_v49, %v768_v51  ;;  %v2918_v39 = vld [vmem:[#allocation10 + $0x160] sm:$0xff]   ;;  %2170 = vmatprep.subr.bf16.mxu0 %v2445_v37  ;;  %v2453_v49 = vld [vmem:[#allocation10 + $0x70] sm:$0xff]   ;;  %v2457_v53 = vld [vmem:[#allocation10 + $0x78] sm:$0xff]  }
 0x2a1   :  { %v756_v62 = vsel %vm360_vm0, %v754_v55, %v755_v41  ;;  %v757_v63 = vsel %vm360_vm0, %v753_v46, %v754_v55  ;;  %v2037_v0 = vpack.c.bf16 %v771_v60, %v772_v57  ;;  %v770_v1 = vsel %vm383_vm1, %v768_v51, %v769_v56  ;;  %v2920_v40 = vld [vmem:[#allocation10 + $0x120] sm:$0xff]   ;;  %2171 = vmatpush3.bf16.msra.mxu0 %v2446_v38  ;;  %v2449_v41 = vld [vmem:[#allocation10 + $0x68] sm:$0xff]   ;;  %v2454_v50 = vld [vmem:[#allocation10 + $0x30] sm:$0xff]  }
 0x2a2   :  { %2032 = vmatmul.mubr.msk.bf16.vlgmr.msra.gmra.mrb[8].mxu1 %vm2817_vm6, %v2031_v58  ;;  %v2034_v2 = vpack.c.bf16 %v756_v62, %v757_v63  ;;  %v773_v3 = vsel %vm383_vm1, %v769_v56, %v766_v47  ;;  %v2924_v46 = vld [vmem:[#allocation10 + $0x168] sm:$0xff]   ;;  %2172 = vmatprep.subr.bf16.mxu0 %v2449_v41  ;;  %v2930_v51 = vld [vmem:[#allocation10 + $0x170] sm:$0xff]   ;;  %v2458_v43 = vld [vmem:[#allocation10 + $0x38] sm:$0xff]  }
 0x2a3   :  { %1124 = vmatpush1.bf16.msra.mxu1 %v2405_v45  ;;  %1112 = vmatprep.mubr.bf16.mxu1 %v781_v52  ;;  %v2040_v5 = vpack.c.bf16 %v773_v3, %v770_v1  ;;  %v2926_v47 = vld [vmem:[#allocation10 + $0x128] sm:$0xff]   ;;  %v2932_v52 = vld [vmem:[#allocation10 + $0x130] sm:$0xff]   ;;  %v2935_v45 = vld [vmem:[#allocation10 + $0x178] sm:$0xff]  }
 0x2a4   :  { %1125 = vmatprep.subr.bf16.mxu1 %v2410_v61  ;;  %v2938_v55 = vld [vmem:[#allocation10 + $0x138] sm:$0xff]   ;;  %v2461_v56 = vld [vmem:[#allocation10 + $0xc0] sm:$0xff]  }
 0x2a5   :  { %2173 = vmatpush3.bf16.msra.mxu0 %v2450_v44 }
 0x2a6   :  { %2174 = vmatprep.subr.bf16.mxu0 %v2453_v49 }
 0x2a7   :  { %1126 = vmatpush1.bf16.msra.mxu1 %v2408_v4 }
 0x2a8   :  { %1127 = vmatprep.subr.bf16.mxu1 %v2413_v6 }
 0x2a9   :  { %2175 = vmatpush3.bf16.msra.mxu0 %v2454_v50 }
 0x2aa   :  { %2035 = vmatmul.mubr.msk.bf16.gmra.mrb[12].mxu1 %vm2856_vm10, %v2034_v2  ;;  %2176 = vmatprep.subr.bf16.mxu0 %v2457_v53 }
 0x2ab   :  { %1128 = vmatpush1.bf16.msra.mxu1 %v2411_v8  ;;  %1155 = vmatprep.mubr.bf16.mxu1 %v2635_v12 }
 0x2ac   :  { %1129 = vmatprep.subr.bf16.mxu1 %v2416_v10 }
 0x2ad   :  { %2177 = vmatpush3.bf16.msra.mxu0 %v2458_v43 }
 0x2ae   :  { %2190 = vmatprep.subr.bf16.mxu0 %v2461_v56 }
 0x2af   :  { %1130 = vmatpush1.bf16.msra.mxu1 %v2414_v11 }
 0x2b0   :  { %1131 = vmatprep.subr.bf16.mxu1 %v2419_v13 }
 0x2b3   :  { %1132 = vmatpush1.bf16.msra.mxu1 %v2417_v14 }
 0x2b4   :  { %1133 = vmatprep.subr.bf16.mxu1 %v2422_v15 }
 0x2b7   :  { %1134 = vmatpush1.bf16.msra.mxu1 %v2420_v16 }
 0x2b8   :  { %1135 = vmatprep.subr.bf16.mxu1 %v2425_v17 }
 0x2bb   :  { %1136 = vmatpush1.bf16.msra.mxu1 %v2423_v18 }
 0x2bc   :  { %1137 = vmatprep.subr.bf16.mxu1 %v2428_v19 }
 0x2bf   :  { %1138 = vmatpush1.bf16.msra.mxu1 %v2426_v20 }
 0x2c0   :  { %2286 = vmatprep.subr.bf16.mxu1 %v2894_v23 }
 0x2c2   :  { %2038 = vmatmul.mubr.msk.bf16.vlgmr.msra.gmra.mrb[8].mxu1 %vm2830_vm7, %v2037_v0 }
 0x2c3   :  { %1165 = vmatprep.mubr.bf16.mxu1 %v2635_v12  ;;  %2294 = vmatpush3.bf16.msra.mxu1 %v2896_v24 }
 0x2c4   :  { %2287 = vmatprep.subr.bf16.mxu1 %v2900_v27 }
 0x2c7   :  { %2295 = vmatpush3.bf16.msra.mxu1 %v2902_v28 }
 0x2c8   :  { %2288 = vmatprep.subr.bf16.mxu1 %v2906_v31 }
 0x2ca   :  { %2041 = vmatmul.mubr.msk.bf16.gmra.mrb[12].mxu1 %vm2841_vm8, %v2040_v5 }
 0x2cb   :  { %2296 = vmatpush3.bf16.msra.mxu1 %v2908_v32 }
 0x2cc   :  { %2289 = vmatprep.subr.bf16.mxu1 %v2912_v35 }
 0x2cf   :  { %2297 = vmatpush3.bf16.msra.mxu1 %v2914_v36 }
 0x2d0   :  { %2290 = vmatprep.subr.bf16.mxu1 %v2918_v39 }
 0x2d3   :  { %2298 = vmatpush3.bf16.msra.mxu1 %v2920_v40 }
 0x2d4   :  { %2291 = vmatprep.subr.bf16.mxu1 %v2924_v46 }
 0x2d7   :  { %2299 = vmatpush3.bf16.msra.mxu1 %v2926_v47 }
 0x2d8   :  { %2292 = vmatprep.subr.bf16.mxu1 %v2930_v51 }
 0x2db   :  { %2300 = vmatpush3.bf16.msra.mxu1 %v2932_v52 }
 0x2dc   :  { %2293 = vmatprep.subr.bf16.mxu1 %v2935_v45 }
 0x2df   :  { %2301 = vmatpush3.bf16.msra.mxu1 %v2938_v55 }
 0x395   :  { %v1157_v57 = vpop.f32.mrb[8].mxu1 }
 0x396   :  { %v2942_v58 = vmax.f32 %v1157_v57, 0.0  ;;  %v1159_v60 = vpop.f32.mrb[9].mxu1 }
 0x397   :  { %v2944_v61 = vmax.f32 %v1159_v60, 0.0  ;;  %v1161_v62 = vpop.f32.mrb[10].mxu1 }
 0x398   :  { %v2946_v63 = vmax.f32 %v1161_v62, 0.0  ;;  %v1163_v0 = vpop.f32.mrb[11].mxu1  ;;  %v1204_v2 = vmul.f32 %v2942_v58, %v2942_v58 }
 0x399   :  { %v2948_v1 = vmax.f32 %v1163_v0, 0.0  ;;  %v1205_v5 = vmul.f32 %v2944_v61, %v2944_v61 }
 0x39a   :  { %v1184_v3 = vadd.f32 %v2946_v63, %v2942_v58  ;;  %v1206_v4 = vmul.f32 %v2946_v63, %v2946_v63 }
 0x39b   :  { %v1193_v6 = vadd.f32 %v2948_v1, %v2944_v61  ;;  %v1207_v8 = vmul.f32 %v2948_v1, %v2948_v1 }
 0x39c   :  { %v1212_v10 = vadd.f32 %v1206_v4, %v1204_v2 }
 0x39d   :  { %v1221_v11 = vadd.f32 %v1207_v8, %v1205_v5  ;;  %v1167_v12 = vpop.f32.mrb[12].mxu1 }
 0x39e   :  { %v2962_v13 = vmax.f32 %v1167_v12, 0.0  ;;  %v1169_v14 = vpop.f32.mrb[13].mxu1 }
 0x39f   :  { %v2964_v15 = vmax.f32 %v1169_v14, 0.0  ;;  %v1171_v16 = vpop.f32.mrb[14].mxu1 }
 0x3a0   :  { %v1185_v17 = vadd.f32 %v1184_v3, %v2962_v13  ;;  %v1208_v18 = vmul.f32 %v2962_v13, %v2962_v13  ;;  %v2969_v19 = vmax.f32 %v1171_v16, 0.0  ;;  %v1173_v20 = vpop.f32.mrb[15].mxu1 }
 0x3a1   :  { %v1194_v21 = vadd.f32 %v1193_v6, %v2964_v15  ;;  %v1209_v22 = vmul.f32 %v2964_v15, %v2964_v15  ;;  %v2974_v25 = vmax.f32 %v1173_v20, 0.0 }
 0x3a2   :  { %v1213_v26 = vadd.f32 %v1212_v10, %v1208_v18  ;;  %v1186_v29 = vadd.f32 %v1185_v17, %v2969_v19  ;;  %v1210_v30 = vmul.f32 %v2969_v19, %v2969_v19 }
 0x3a3   :  { %v1222_v33 = vadd.f32 %v1221_v11, %v1209_v22  ;;  %v1195_v34 = vadd.f32 %v1194_v21, %v2974_v25  ;;  %v1211_v37 = vmul.f32 %v2974_v25, %v2974_v25 }
 0x3a4   :  { %v1187_v38 = vrot.slane %v1186_v29, 4  ;;  %v1214_v41 = vadd.f32 %v1213_v26, %v1210_v30 }
 0x3a5   :  { %v1196_v44 = vrot.slane %v1195_v34, 4  ;;  %v1223_v49 = vadd.f32 %v1222_v33, %v1211_v37 }
 0x3a6   :  { %v1188_v50 = vadd.f32 %v1187_v38, %v1186_v29  ;;  %v1215_v53 = vrot.slane %v1214_v41, 4 }
 0x3a7   :  { %v1197_v43 = vadd.f32 %v1196_v44, %v1195_v34  ;;  %v1224_v56 = vrot.slane %v1223_v49, 4 }
 0x3a8   :  { %v1189_v57 = vrot.slane %v1188_v50, 2  ;;  %v1216_v60 = vadd.f32 %v1215_v53, %v1214_v41 }
 0x3a9   :  { %v1198_v62 = vrot.slane %v1197_v43, 2  ;;  %v1225_v0 = vadd.f32 %v1224_v56, %v1223_v49 }
 0x3aa   :  { %v1190_v2 = vadd.f32 %v1189_v57, %v1188_v50  ;;  %v1217_v3 = vrot.slane %v1216_v60, 2  ;;  %v2636_v50 = vmov 1966171168  }
 0x3ab   :  { %v1199_v4 = vadd.f32 %v1198_v62, %v1197_v43  ;;  %v1226_v5 = vrot.slane %v1225_v0, 2  ;;  %v1247_v53 = vunpack.c.l.s4 %v2636_v50 }
 0x3ac   :  { %v1191_v6 = vrot.slane %v1190_v2, 1  ;;  %v1218_v8 = vadd.f32 %v1217_v3, %v1216_v60 }
 0x3ad   :  { %v1200_v10 = vrot.slane %v1199_v4, 1  ;;  %v1227_v11 = vadd.f32 %v1226_v5, %v1225_v0  ;;  %v1248_v43 = vunpack.c.0.s8 %v1247_v53 }
 0x3ae   :  { %v1192_v12 = vadd.f32 %v1191_v6, %v1190_v2  ;;  %v1219_v14 = vrot.slane %v1218_v8, 1  ;;  %v1238_v2 = vld [vmem:[%s3127_s8] sm:$0x3] }
 0x3af   :  { %v1201_v16 = vadd.f32 %v1200_v10, %v1199_v4  ;;  %v1228_v17 = vrot.slane %v1227_v11, 1  ;;  %v1251_v57 = vsub.s32 %v1248_v43, %v2787_v7  ;;  %v1270_v4 = vsub.s32 1, %v2787_v7  ;;  %v2472_v7 = vld [vmem:[#allocation10 + $0xa8] sm:$0xff]  }
 0x3b0   :  { %v1202_v18 = vmul.f32 0.03125, %v1192_v12  ;;  %v1220_v20 = vadd.f32 %v1219_v14, %v1218_v8 }
 0x3b1   :  { %v1203_v21 = vmul.f32 0.03125, %v1201_v16  ;;  %v1229_v22 = vadd.f32 %v1228_v17, %v1227_v11 }
 0x3b2   :  { %v1230_v26 = vmul.f32 0.03125, %v1220_v20  ;;  %v1232_v29 = vmul.f32 %v1202_v18, %v1202_v18 }
 0x3b3   :  { %v1231_v30 = vmul.f32 0.03125, %v1229_v22  ;;  %v1233_v33 = vmul.f32 %v1203_v21, %v1203_v21 }
 0x3b4   :  { %v1234_v34 = vsub.f32 %v1230_v26, %v1232_v29 }
 0x3b5   :  { %v1235_v37 = vsub.f32 %v1231_v30, %v1233_v33 }
 0x3b6   :  { %v1236_v38 = vmax.f32 %v1234_v34, 0.0 }
 0x3b7   :  { %v1237_v41 = vmax.f32 %v1235_v37, 0.0 }
 0x3b8   :  { %v1239_v44 = vadd.f32 1e-05, %v1236_v38 }
 0x3b9   :  { %v1240_v49 = vadd.f32 1e-05, %v1237_v41 }
 0x3ba   :  { %2481 = vrsqrt.f32 %v1239_v44 }
 0x3bb   :  { %2483 = vrsqrt.f32 %v1240_v49 }
 0x3c4   :  { %v2482_v56 = vpop.eup %2481 }
 0x3c5   :  { %v2484_v60 = vpop.eup %2483 }
 0x3c6   :  { %v1245_v62 = vcombine.low %v2482_v56, %v2484_v60 }
 0x3c8   :  { %v1252_v0 = vrot.slane %v1245_v62, %v1251_v57 }
 0x3ca   :  { %v1259_v3 = vrot.slane %v1252_v0, %v1251_v57 }
 0x3cc   :  { %v1261_v5 = vmul.f32 %v1259_v3, %v1238_v2 }
 0x3ce   :  { %v1267_v6 = vrot.slane %v1261_v5, %v2793_v9  ;;  %v1271_v8 = vrot.slane %v1261_v5, %v1270_v4 }
 0x3d0   :  { %v1274_v10 = vmul.f32 %v1267_v6, %v1202_v18  ;;  %v1275_v11 = vmul.f32 %v1271_v8, %v1203_v21  ;;  %v1299_v12 = vmul.f32 %v1267_v6, %v2962_v13  ;;  %v1302_v14 = vmul.f32 %v1271_v8, %v2974_v25  ;;  %v1262_v13 = vld [vmem:[%s3128_s9] sm:$0x3]  ;;  %s2637_s9 = smov [#allocation11]  }
 0x3d1   :  { %v1296_v16 = vmul.f32 %v1271_v8, %v2944_v61  ;;  %v1298_v17 = vmul.f32 %v1271_v8, %v2948_v1  ;;  %v1300_v20 = vmul.f32 %v1271_v8, %v2964_v15  ;;  %v1295_v22 = vmul.f32 %v1267_v6, %v2942_v58  ;;  %s1922_s15 = sshll.u32 %s2637_s9, 4  ;;  %s1923_s15 = int_to_ptr.vmem [resolvable:$true] %s1922_s15 }
 0x3d2   :  { %v1278_v26 = vcombine.low %v1274_v10, %v1275_v11  ;;  %v1297_v29 = vmul.f32 %v1267_v6, %v2946_v63  ;;  %v1301_v30 = vmul.f32 %v1267_v6, %v2969_v19  ;;  %v2462_v10 = vld [vmem:[#allocation10 + $0x80] sm:$0xff]   ;;  %s2595_s0 = scalar_lea.vmem %s1923_s15, 512  ;;  %p2600_p13 = scmp.lt.s32.totalorder %s1923_s15, %s1923_s15 }
 0x3d3   :  { %p2596_p12 = scmp.ne.s32.totalorder %s1923_s15, %s2595_s0  ;;  %p2601_p0 = scmp.lt.s32.totalorder %s2595_s0, %s2595_s0 }
 0x3d4   :  { %v1285_v33 = vrot.slane %v1278_v26, %v1251_v57 }
 0x3d5   :  { %p2602_p1 = por %p2601_p0, %p2600_p13 }
 0x3d6   :  { %v1292_v18 = vrot.slane %v1285_v33, %v1251_v57 }
 0x3d7   :  { %p2603_p2 = pnand %p2602_p1, %p2596_p12 }
 0x3d8   :  { %v1294_v25 = vsub.f32 %v1262_v13, %v1292_v18 }
 0x3da   :  { %v1307_v61 = vrot.slane %v1294_v25, %v2793_v9  ;;  %v1311_v21 = vrot.slane %v1294_v25, %v1270_v4 }
 0x3dc   :  { %v3000_v1 = vadd.f32 %v1307_v61, %v1299_v12  ;;  %v3002_v15 = vadd.f32 %v1311_v21, %v1302_v14  ;;  %v3004_v58 = vadd.f32 %v1311_v21, %v1296_v16  ;;  %v3006_v34 = vadd.f32 %v1311_v21, %v1298_v17  ;;  %v2463_v17 = vld [vmem:[#allocation10 + $0xc8] sm:$0xff]  }
 0x3dd   :  { %v3008_v63 = vadd.f32 %v1311_v21, %v1300_v20  ;;  %v3010_v19 = vadd.f32 %v1307_v61, %v1295_v22  ;;  %v3012_v37 = vadd.f32 %v1307_v61, %v1297_v29  ;;  %v3014_v38 = vadd.f32 %v1307_v61, %v1301_v30 }
 0x3de   :  { %v1329_v41 = vrot.slane %v3002_v15, 7  ;;  %v1357_v9 = vrot.slane %v3002_v15, 1  ;;  %v1323_v44 = vrot.slane %v3004_v58, 7  ;;  %v1325_v49 = vrot.slane %v3006_v34, 7 }
 0x3df   :  { %v1351_v50 = vrot.slane %v3004_v58, 1  ;;  %v1355_v53 = vrot.slane %v3008_v63, 1  ;;  %v1322_v43 = vrot.slane %v3010_v19, 7  ;;  %v1324_v56 = vrot.slane %v3012_v37, 7 }
 0x3e0   :  { %v1335_v57 = vsel %vm360_vm0, %v1323_v44, %v1325_v49  ;;  %v1337_v60 = vsel %vm360_vm0, %v1329_v41, %v1323_v44  ;;  %v1328_v62 = vrot.slane %v3014_v38, 7  ;;  %v1350_v0 = vrot.slane %v3010_v19, 1 }
 0x3e1   :  { %v2091_v2 = vpack.c.bf16 %v1335_v57, %v1337_v60  ;;  %v1359_v3 = vsel %vm383_vm1, %v1355_v53, %v1357_v9  ;;  %v1365_v4 = vsel %vm383_vm1, %v1357_v9, %v1351_v50  ;;  %v1334_v5 = vsel %vm360_vm0, %v1322_v43, %v1324_v56  ;;  %v2471_v57 = vld [vmem:[#allocation10 + $0xe8] sm:$0xff]   ;;  %v2473_v60 = vld [vmem:[#allocation10 + $0xf0] sm:$0xff]  }
 0x3e2   :  { %v2109_v6 = vpack.c.bf16 %v1365_v4, %v1359_v3  ;;  %v1336_v8 = vsel %vm360_vm0, %v1328_v62, %v1322_v43  ;;  %v1354_v11 = vrot.slane %v3000_v1, 1  ;;  %v1356_v12 = vrot.slane %v3014_v38, 1 }
 0x3e3   :  { %2092 = vmatprep.mubr.msk.bf16.mxu0 %vm2817_vm6, %v2091_v2  ;;  %v2094_v14 = vpack.c.bf16 %v1334_v5, %v1336_v8  ;;  %v1327_v16 = vrot.slane %v3008_v63, 7  ;;  %v1326_v20 = vrot.slane %v3000_v1, 7  ;;  %v1379_v22 = vpack.c.bf16 %v3006_v34, %v3004_v58  ;;  %v2464_v58 = vld [vmem:[#allocation10 + $0x88] sm:$0xff]  }
 0x3e4   :  { %2110 = vmatprep.mubr.msk.bf16.mxu1 %vm2841_vm8, %v2109_v6  ;;  %v1358_v26 = vsel %vm383_vm1, %v1354_v11, %v1356_v12  ;;  %v1364_v29 = vsel %vm383_vm1, %v1356_v12, %v1350_v0  ;;  %v1378_v30 = vpack.c.bf16 %v3012_v37, %v3010_v19  ;;  %v1381_v33 = vpack.c.bf16 %v3002_v15, %v3008_v63  ;;  %v2465_v63 = vld [vmem:[#allocation10 + $0xd0] sm:$0xff]  }
 0x3e5   :  { %2095 = vmatmul.mubr.msk.bf16.vlgmr.msra.gmra.mrb[8].mxu0 %vm2817_vm6, %v2094_v14  ;;  %v2112_v13 = vpack.c.bf16 %v1364_v29, %v1358_v26  ;;  %v1331_v18 = vsel %vm360_vm0, %v1327_v16, %v1329_v41  ;;  %v1333_v25 = vsel %vm360_vm0, %v1325_v49, %v1327_v16  ;;  %v1330_v61 = vsel %vm360_vm0, %v1326_v20, %v1328_v62  ;;  %v2474_v62 = vld [vmem:[#allocation10 + $0xb0] sm:$0xff]  }
 0x3e6   :  { %2191 = vmatpush3.bf16.msra.mxu0 %v2462_v10  ;;  %v2097_v21 = vpack.c.bf16 %v1331_v18, %v1333_v25  ;;  %v1332_v19 = vsel %vm360_vm0, %v1324_v56, %v1326_v20  ;;  %v1380_v42 = vpack.c.bf16 %v3014_v38, %v3000_v1  ;;  %v1353_v15 = vrot.slane %v3006_v34, 1  ;;  %v2466_v38 = vld [vmem:[#allocation10 + $0x90] sm:$0xff]   ;;  %v2470_v56 = vld [vmem:[#allocation10 + $0xa0] sm:$0xff]  }
 0x3e7   :  { %2113 = vmatmul.mubr.msk.bf16.vlgmr.msra.gmra.mrb[16].mxu1 %vm2841_vm8, %v2112_v13  ;;  %2192 = vmatprep.subr.bf16.mxu0 %v2463_v17  ;;  %v2100_v41 = vpack.c.bf16 %v1330_v61, %v1332_v19  ;;  %v1352_v9 = vrot.slane %v3012_v37, 1  ;;  %v2467_v37 = vld [vmem:[#allocation10 + $0xd8] sm:$0xff]  }
 0x3e8   :  { %2098 = vmatprep.mubr.msk.bf16.mxu0 %vm2856_vm10, %v2097_v21  ;;  %v1361_v44 = vsel %vm383_vm1, %v1353_v15, %v1355_v53  ;;  %v1363_v49 = vsel %vm383_vm1, %v1351_v50, %v1353_v15  ;;  %v2468_v53 = vld [vmem:[#allocation10 + $0x98] sm:$0xff]   ;;  %v2469_v50 = vld [vmem:[#allocation10 + $0xe0] sm:$0xff]  }
 0x3e9   :  { %v2103_v1 = vpack.c.bf16 %v1361_v44, %v1363_v49  ;;  %v1360_v34 = vsel %vm383_vm1, %v1352_v9, %v1354_v11  ;;  %v1362_v54 = vsel %vm383_vm1, %v1350_v0, %v1352_v9  ;;  %v2475_v0 = vld [vmem:[#allocation10 + $0xf8] sm:$0xff]  }
 0x3ea   :  { %2193 = vmatpush3.bf16.msra.mxu0 %v2464_v58  ;;  %v2106_v43 = vpack.c.bf16 %v1360_v34, %v1362_v54 }
 0x3eb   :  { %2194 = vmatprep.subr.bf16.mxu0 %v2465_v63 }
 0x3ed   :  { %2101 = vmatmul.mubr.msk.bf16.gmra.mrb[12].mxu0 %vm2856_vm10, %v2100_v41 }
 0x3ee   :  { %2195 = vmatpush3.bf16.msra.mxu0 %v2466_v38  ;;  %1847 = vmatprep.mubr.bf16.mxu0 %v1379_v22 }
 0x3ef   :  { %2196 = vmatprep.subr.bf16.mxu0 %v2467_v37 }
 0x3f2   :  { %2197 = vmatpush3.bf16.msra.mxu0 %v2468_v53 }
 0x3f3   :  { %2198 = vmatprep.subr.bf16.mxu0 %v2469_v50 }
 0x3f6   :  { %2199 = vmatpush3.bf16.msra.mxu0 %v2470_v56 }
 0x3f7   :  { %2200 = vmatprep.subr.bf16.mxu0 %v2471_v57 }
 0x3fa   :  { %2201 = vmatpush3.bf16.msra.mxu0 %v2472_v7 }
 0x3fb   :  { %2202 = vmatprep.subr.bf16.mxu0 %v2473_v60 }
 0x3fe   :  { %2203 = vmatpush3.bf16.msra.mxu0 %v2474_v62 }
 0x3ff   :  { %2204 = vmatprep.subr.bf16.mxu0 %v2475_v0 }
 0x402   :  { %2205 = vmatpush3.bf16.msra.mxu0 %v2476_v59 }
 0x403   :  { %2218 = vmatprep.subr.bf16.mxu0 %v2894_v23 }
 0x405   :  { %1848 = vmatmul.mubr.bf16.vlgmr.msra.gmra.mrb[16].mxu0 %v1378_v30 }
 0x406   :  { %1855 = vmatprep.mubr.bf16.mxu0 %v1381_v33  ;;  %2219 = vmatpush3.bf16.msra.mxu0 %v2896_v24 }
 0x407   :  { %2220 = vmatprep.subr.bf16.mxu0 %v2900_v27 }
 0x40a   :  { %2221 = vmatpush3.bf16.msra.mxu0 %v2902_v28 }
 0x40b   :  { %2222 = vmatprep.subr.bf16.mxu0 %v2906_v31 }
 0x40d   :  { %1856 = vmatmul.mubr.bf16.gmra.mrb[20].mxu0 %v1380_v42 }
 0x40e   :  { %2223 = vmatpush3.bf16.msra.mxu0 %v2908_v32  ;;  %2104 = vmatprep.mubr.msk.bf16.mxu0 %vm2830_vm7, %v2103_v1 }
 0x40f   :  { %2224 = vmatprep.subr.bf16.mxu0 %v2912_v35 }
 0x412   :  { %2225 = vmatpush3.bf16.msra.mxu0 %v2914_v36 }
 0x413   :  { %2226 = vmatprep.subr.bf16.mxu0 %v2918_v39 }
 0x416   :  { %2227 = vmatpush3.bf16.msra.mxu0 %v2920_v40 }
 0x417   :  { %2228 = vmatprep.subr.bf16.mxu0 %v2924_v46 }
 0x41a   :  { %2229 = vmatpush3.bf16.msra.mxu0 %v2926_v47 }
 0x41b   :  { %2230 = vmatprep.subr.bf16.mxu0 %v2930_v51 }
 0x41e   :  { %2231 = vmatpush3.bf16.msra.mxu0 %v2932_v52 }
 0x41f   :  { %2232 = vmatprep.subr.bf16.mxu0 %v2935_v45 }
 0x422   :  { %2233 = vmatpush3.bf16.msra.mxu0 %v2938_v55 }
 0x425   :  { %2107 = vmatmul.mubr.msk.bf16.vlgmr.msra.gmra.mrb[24].mxu0 %vm2830_vm7, %v2106_v43 }
 0x4b8   :  { %v2178_v23 = vpop.f32.mrb[8].mxu0 }
 0x4b9   :  { %v2179_v24 = vpop.f32.mrb[9].mxu0 }
 0x4ba   :  { %v2240_v27 = vpop.f32.mrb[16].mxu1  ;;  %v2180_v28 = vadd.f32 %v2179_v24, %v2178_v23  ;;  %v2181_v31 = vpop.f32.mrb[10].mxu0 }
 0x4bb   :  { %v2241_v32 = vpop.f32.mrb[17].mxu1  ;;  %v2182_v35 = vpop.f32.mrb[11].mxu0 }
 0x4bc   :  { %v2242_v36 = vadd.f32 %v2241_v32, %v2240_v27  ;;  %v2243_v39 = vpop.f32.mrb[18].mxu1  ;;  %v2183_v40 = vadd.f32 %v2182_v35, %v2181_v31 }
 0x4bd   :  { %v2244_v46 = vpop.f32.mrb[19].mxu1 }
 0x4be   :  { %v2245_v47 = vadd.f32 %v2244_v46, %v2243_v39 }
 0x4c0   :  { %v2184_v51 = vpop.f32.mrb[12].mxu0 }
 0x4c1   :  { %v2185_v52 = vpop.f32.mrb[13].mxu0 }
 0x4c2   :  { %v2186_v45 = vadd.f32 %v2185_v52, %v2184_v51  ;;  %v2187_v2 = vpop.f32.mrb[14].mxu0 }
 0x4c3   :  { %v2188_v55 = vpop.f32.mrb[15].mxu0 }
 0x4c4   :  { %v2189_v3 = vadd.f32 %v2188_v55, %v2187_v2 }
 0x4d8   :  { %v2206_v48 = vpop.f32.mrb[16].mxu0 }
 0x4d9   :  { %v2207_v4 = vpop.f32.mrb[17].mxu0 }
 0x4da   :  { %v2208_v5 = vadd.f32 %v2207_v4, %v2206_v48  ;;  %v2209_v6 = vpop.f32.mrb[18].mxu0 }
 0x4db   :  { %v2210_v8 = vpop.f32.mrb[19].mxu0 }
 0x4dc   :  { %v1850_v10 = vadd.f32 %v2208_v5, %v2180_v28  ;;  %v2211_v11 = vadd.f32 %v2210_v8, %v2209_v6 }
 0x4de   :  { %v1853_v12 = vadd.f32 %v2211_v11, %v2183_v40 }
 0x4e0   :  { %v2212_v14 = vpop.f32.mrb[20].mxu0 }
 0x4e1   :  { %v2213_v16 = vpop.f32.mrb[21].mxu0 }
 0x4e2   :  { %v2214_v17 = vadd.f32 %v2213_v16, %v2212_v14  ;;  %v2215_v20 = vpop.f32.mrb[22].mxu0 }
 0x4e3   :  { %v2216_v22 = vpop.f32.mrb[23].mxu0 }
 0x4e4   :  { %v1858_v26 = vadd.f32 %v2214_v17, %v2186_v45  ;;  %v2217_v29 = vadd.f32 %v2216_v22, %v2215_v20 }
 0x4e6   :  { %v1907_v30 = vadd.f32 %v2242_v36, %v1858_v26  ;;  %v1861_v33 = vadd.f32 %v2217_v29, %v2189_v3 }
 0x4e8   :  { %1915 = vst [vmem:[#allocation11 + $0x10] sm:$0xff] %v1907_v30  ;;  %v1910_v13 = vadd.f32 %v2245_v47, %v1861_v33 }
 0x4ea   :  { %1916 = vst [vmem:[#allocation11 + $0x18] sm:$0xff] %v1910_v13 }
 0x4f8   :  { %v2234_v18 = vpop.f32.mrb[24].mxu0 }
 0x4f9   :  { %v2235_v25 = vpop.f32.mrb[25].mxu0 }
 0x4fa   :  { %v2236_v61 = vadd.f32 %v2235_v25, %v2234_v18  ;;  %v2237_v21 = vpop.f32.mrb[26].mxu0 }
 0x4fb   :  { %v2238_v58 = vpop.f32.mrb[27].mxu0 }
 0x4fc   :  { %v1899_v19 = vadd.f32 %v2236_v61, %v1850_v10  ;;  %v2239_v42 = vadd.f32 %v2238_v58, %v2237_v21 }
 0x4fe   :  { %1913 = vst [vmem:[#allocation11] sm:$0xff] %v1899_v19  ;;  %v1902_v15 = vadd.f32 %v2239_v42, %v1853_v12 }
 0x500   :  { %1914 = vst [vmem:[#allocation11 + $0x8] sm:$0xff] %v1902_v15 }
 0x501   :  { %2606 = shalt.err (!%p2603_p2)
}
 0x502   :  { %s2607_s17 = scalar_lea.hbm %s3130_s11, 512 }
 0x503   :  { %p2608_p3 = scmp.ne.s32.totalorder %s3130_s11, %s2607_s17  ;;  %p2611_p4 = scmp.lt.u32.totalorder %s2607_s17, %s3130_s11 }
 0x505   :  { %p2613_p5 = pnand %p2611_p4, %p2608_p3 }
 0x507   :  { %2616 = shalt.err (!%p2613_p5)
}
 0x508   :  { %1928 = dma.vmem_to_hbm [thread:$0]  %s1923_s15, 512, %s3130_s11, [#allocation4], %s2629_s1, %s2629_s1, %s2630_s18  }
 0x509   :  { %2623 = dma.done.wait [#allocation4], 512  }
 0x50a   :  { %2624 = vsyncadd [#allocation4], 4294966784 }
 0x50b   :  { %1932 = vsyncpa [#allocation3], 1 }
 0x50c   :  { %1933 = vsyncpa [#allocation6], 1 }
 0x50d   :  { %1934 = vsyncpa [#allocation9], 1 }
 0x50e   :  { %1935 = vsyncpa [#allocation4], 1 }

</bundles_post_ra>
